<compile_context>
chip_gen: v6e
topology: v6e:2x2x1
jax: 0.10.0
libtpu: 0.0.40
codegen_flags: <defaults>
</compile_context>

<pallas_src>
import functools
import math

import jax
import jax.numpy as jnp
import numpy as np
from jax import lax
from jax.experimental import pallas as pl
from jax.experimental.pallas import tpu as pltpu

EPS = 1e-5          # nn.LayerNorm default eps
NEG_INF = -1e30     # stand-in for -inf used by masked_fill (same post-softmax result)
INV_SQRT2 = 0.7071067811865476


def attention_block_kernel(
    x_ref, pad_ref, amask_ref,
    g1_ref, be1_ref,
    wqkv_ref, bqkv_ref,
    wo_ref, bo_ref,
    g2_ref, be2_ref,
    w1_ref, bl1_ref, w2_ref, bl2_ref,
    o_ref,
    *, num_heads, bt,
):
    _, S, E = x_ref.shape
    hd = E // num_heads
    scale = 1.0 / math.sqrt(hd)
    R = bt * S                                           # rows processed this step

    x = x_ref[...].reshape(R, E)                         # (R, E) f32, batch-major rows
    amask = amask_ref[...]                               # (S, S) additive float mask

    # Combined additive mask (attn_mask + key_padding_mask), computed once.
    pad_bias = jnp.where(pad_ref[...] > 0.5, NEG_INF, 0.0)      # (bt, 1, S)
    masks = amask[None, :, :] + pad_bias                         # (bt, S, S)

    def layer_norm(z, g, b):
        mu = jnp.mean(z, axis=-1, keepdims=True)
        var = jnp.mean(jnp.square(z - mu), axis=-1, keepdims=True)
        return (z - mu) * lax.rsqrt(var + EPS) * g + b

    # --- self-attention branch (pre-LN) ---
    xn = layer_norm(x, g1_ref[...], be1_ref[...])

    qkv = jnp.dot(xn.astype(jnp.bfloat16), wqkv_ref[...],
                  preferred_element_type=jnp.float32) + bqkv_ref[...]      # (R, 3E)
    q = qkv[:, 0 * E:1 * E] * scale        # fold 1/sqrt(hd) into q once
    k = qkv[:, 1 * E:2 * E]
    v = qkv[:, 2 * E:3 * E]

    def to_heads(z2d):                     # (S, E) -> (NH, S, hd) bf16 MXU operand
        return jnp.transpose(
            z2d.reshape(S, num_heads, hd), (1, 0, 2)).astype(jnp.bfloat16)

    ctx_rows = []
    for b in range(bt):                    # static loop, bt is small
        rows = slice(b * S, (b + 1) * S)   # sublane-aligned row slab (batch-major)
        qh = to_heads(q[rows])
        kh = to_heads(k[rows])
        vh = to_heads(v[rows])

        scores = jnp.einsum('nqd,nkd->nqk', qh, kh,
                            preferred_element_type=jnp.float32)            # (NH, S, S)
        scores = scores + masks[b]
        m = jnp.max(scores, axis=-1, keepdims=True)
        p = jnp.exp(scores - m)
        inv = pl.reciprocal(jnp.sum(p, axis=-1, keepdims=True), approx=True)
        p = p * inv
        ctx = jnp.einsum('nqk,nkd->nqd', p.astype(jnp.bfloat16), vh,
                         preferred_element_type=jnp.float32)               # (NH, S, hd)
        ctx_rows.append(jnp.transpose(ctx, (1, 0, 2)).reshape(S, E))       # (S, E)

    ctx_all = ctx_rows[0] if bt == 1 else jnp.concatenate(ctx_rows, axis=0)  # (R, E)

    attn = jnp.dot(ctx_all.astype(jnp.bfloat16), wo_ref[...],
                   preferred_element_type=jnp.float32) + bo_ref[...]

    r1 = x + attn

    # --- MLP branch (pre-LN) ---
    yn = layer_norm(r1, g2_ref[...], be2_ref[...])
    h1 = jnp.dot(yn.astype(jnp.bfloat16), w1_ref[...],
                 preferred_element_type=jnp.float32) + bl1_ref[...]
    h1 = 0.5 * h1 * (1.0 + lax.erf(h1 * INV_SQRT2))       # exact GELU (nn.GELU default)
    h2 = jnp.dot(h1.astype(jnp.bfloat16), w2_ref[...],
                 preferred_element_type=jnp.float32) + bl2_ref[...]

    o_ref[...] = (r1 + h2).reshape(bt, S, E)


def init_params(key, embed_dim, hidden_dim):
    """Deterministic synthetic parameters matching the PyTorch module's shapes."""
    E, H = embed_dim, hidden_dim
    ks = jax.random.split(key, 8)
    s = 0.05
    in_proj_w = jax.random.normal(ks[0], (3 * E, E), jnp.float32) * s   # [Wq; Wk; Wv]
    in_proj_b = jax.random.normal(ks[1], (3 * E,), jnp.float32) * s
    out_w = jax.random.normal(ks[2], (E, E), jnp.float32) * s
    out_b = jax.random.normal(ks[3], (E,), jnp.float32) * s
    w1 = jax.random.normal(ks[4], (H, E), jnp.float32) * s
    b1 = jax.random.normal(ks[5], (H,), jnp.float32) * s
    w2 = jax.random.normal(ks[6], (E, H), jnp.float32) * s
    b2 = jax.random.normal(ks[7], (E,), jnp.float32) * s

    bf16 = jnp.bfloat16
    # Kernel-friendly forms: transposed weights (y = x @ W), fused QKV, 2-D biases,
    # MXU-feeding weights stored in bf16 (halves HBM traffic + VMEM footprint).
    params = dict(
        g1=jnp.ones((1, E), jnp.float32), be1=jnp.zeros((1, E), jnp.float32),
        wqkv=in_proj_w.T.astype(bf16),                 # (E, 3E) = [Wq.T | Wk.T | Wv.T]
        bqkv=in_proj_b.reshape(1, 3 * E),
        wo=out_w.T.astype(bf16), bo=out_b.reshape(1, E),
        g2=jnp.ones((1, E), jnp.float32), be2=jnp.zeros((1, E), jnp.float32),
        w1=w1.T.astype(bf16), bl1=b1.reshape(1, H),
        w2=w2.T.astype(bf16), bl2=b2.reshape(1, E),
    )
    return params


PARAM_ORDER = ["g1", "be1", "wqkv", "bqkv", "wo", "bo",
               "g2", "be2", "w1", "bl1", "w2", "bl2"]


def _pick_batch_block(B):
    for cand in (8, 4, 2, 1):
        if cand <= B and B % cand == 0:
            return cand
    return 1


def attention_block(x_sbe, padding_mask, attention_mask, params, num_heads,
                    batch_block=None):
    """Mirrors AttentionBlock.forward: returns (out, padding_mask, attention_mask)."""
    S, B, E = x_sbe.shape
    bt = batch_block or _pick_batch_block(B)
    assert B % bt == 0

    # Batch-major layout: one HBM-bandwidth transpose so each grid step sees a
    # contiguous (bt, S, E) slab (tall MXU M dim, aligned per-batch row slices).
    x = jnp.transpose(x_sbe, (1, 0, 2))                         # (B, S, E)
    pad_f = padding_mask.astype(jnp.float32).reshape(B, 1, S)   # (B, 1, S), 1.0 = padded
    amask = attention_mask.astype(jnp.float32)                  # (S, S) additive

    def const_spec(arr):    # full-array block, constant index -> fetched once
        nd = arr.ndim
        return pl.BlockSpec(arr.shape, lambda i, _nd=nd: (0,) * _nd)

    in_specs = [
        pl.BlockSpec((bt, S, E), lambda i: (i, 0, 0)),   # x (batch-blocked)
        pl.BlockSpec((bt, 1, S), lambda i: (i, 0, 0)),   # key padding mask
        pl.BlockSpec((S, S), lambda i: (0, 0)),          # additive attention mask
    ] + [const_spec(params[name]) for name in PARAM_ORDER]

    out = pl.pallas_call(
        functools.partial(attention_block_kernel, num_heads=num_heads, bt=bt),
        out_shape=jax.ShapeDtypeStruct((B, S, E), jnp.float32),
        grid=(B // bt,),
        in_specs=in_specs,
        out_specs=pl.BlockSpec((bt, S, E), lambda i: (i, 0, 0)),
        compiler_params=pltpu.CompilerParams(
            dimension_semantics=("parallel",),
            vmem_limit_bytes=48 * 1024 * 1024,
        ),
    )(x, pad_f, amask, *[params[name] for name in PARAM_ORDER])

    return jnp.transpose(out, (1, 0, 2)), padding_mask, attention_mask


def reference_forward(x_sbe, padding_mask, attention_mask, params, num_heads):
    """Pure-JAX f32 reference for correctness checking."""
    S, B, E = x_sbe.shape
    hd = E // num_heads
    f32 = lambda a: a.astype(jnp.float32)
    x = jnp.transpose(x_sbe, (1, 0, 2))                         # (B, S, E)

    def ln(z, g, b):
        mu = z.mean(-1, keepdims=True)
        var = ((z - mu) ** 2).mean(-1, keepdims=True)
        return (z - mu) / jnp.sqrt(var + EPS) * g + b

    xn = ln(x, params["g1"], params["be1"])
    qkv = xn @ f32(params["wqkv"]) + params["bqkv"]             # (B, S, 3E)
    q = qkv[..., 0 * E:1 * E].reshape(B, S, num_heads, hd)
    k = qkv[..., 1 * E:2 * E].reshape(B, S, num_heads, hd)
    v = qkv[..., 2 * E:3 * E].reshape(B, S, num_heads, hd)
    scores = jnp.einsum("bqhd,bkhd->bhqk", q, k) / math.sqrt(hd)
    scores = scores + attention_mask[None, None]
    scores = jnp.where(padding_mask[:, None, None, :], NEG_INF, scores)
    w = jax.nn.softmax(scores, axis=-1)
    attn = jnp.einsum("bhqk,bkhd->bqhd", w, v).reshape(B, S, E)
    attn = attn @ f32(params["wo"]) + params["bo"]
    r1 = x + attn
    yn = ln(r1, params["g2"], params["be2"])
    h1 = yn @ f32(params["w1"]) + params["bl1"]
    h1 = 0.5 * h1 * (1.0 + lax.erf(h1 * INV_SQRT2))
    out = r1 + h1 @ f32(params["w2"]) + params["bl2"]
    return jnp.transpose(out, (1, 0, 2))


if __name__ == "__main__":
    # small shapes: seq=8, batch=2, embed_dim=32, hidden_dim=64, num_heads=4
    S, B, E, H, NH = 8, 2, 32, 64, 4

    key = jax.random.PRNGKey(0)
    k_x, k_p = jax.random.split(key)

    x = jax.random.normal(k_x, (S, B, E), jnp.float32)        # (seq, batch, embed)
    # key_padding_mask: True = padded key (mask out).  Last two keys of batch 1.
    padding_mask = jnp.zeros((B, S), jnp.bool_).at[1, S - 2:].set(True)
    # float additive attn_mask: causal (-1e9 above the diagonal)
    attention_mask = jnp.where(
        jnp.triu(jnp.ones((S, S), jnp.bool_), k=1), -1e9, 0.0).astype(jnp.float32)

    params = init_params(k_p, E, H)

    out, pm, am = attention_block(x, padding_mask, attention_mask, params, NH)
    out = jax.block_until_ready(out)

    ref = reference_forward(x, padding_mask, attention_mask, params, NH)
    # bf16 MXU operands in the kernel vs f32 reference -> slightly wider tolerance.
    np.testing.assert_allclose(np.asarray(out), np.asarray(ref), rtol=2e-2, atol=2e-2)

    print("KERNEL_OK")
</pallas_src>

<mosaic_0001>
module attributes {stable_mosaic.version = 11 : i64} {
  func.func @attention_block_kernel(%arg0: i32, %arg1: memref<2x8x32xf32, #tpu.memory_space<vmem>>, %arg2: memref<2x1x8xf32, #tpu.memory_space<vmem>>, %arg3: memref<8x8xf32, #tpu.memory_space<vmem>>, %arg4: memref<1x32xf32, #tpu.memory_space<vmem>>, %arg5: memref<1x32xf32, #tpu.memory_space<vmem>>, %arg6: memref<32x96xbf16, #tpu.memory_space<vmem>>, %arg7: memref<1x96xf32, #tpu.memory_space<vmem>>, %arg8: memref<32x32xbf16, #tpu.memory_space<vmem>>, %arg9: memref<1x32xf32, #tpu.memory_space<vmem>>, %arg10: memref<1x32xf32, #tpu.memory_space<vmem>>, %arg11: memref<1x32xf32, #tpu.memory_space<vmem>>, %arg12: memref<32x64xbf16, #tpu.memory_space<vmem>>, %arg13: memref<1x64xf32, #tpu.memory_space<vmem>>, %arg14: memref<64x32xbf16, #tpu.memory_space<vmem>>, %arg15: memref<1x32xf32, #tpu.memory_space<vmem>>, %arg16: memref<2x8x32xf32, #tpu.memory_space<vmem>>) attributes {dimension_semantics = [#tpu.dimension_semantics<parallel>], iteration_bounds = array<i64: 1>, scalar_prefetch = 0 : i64, scratch_operands = 0 : i64, tpu.core_type = #tpu.core_type<tc>, window_params = [{transform_indices = @transform_0, window_bounds = array<i64: 2, 8, 32>}, {transform_indices = @transform_1, window_bounds = array<i64: 2, 1, 8>}, {pipeline_mode = #tpu.pipeline_mode<synchronous>, transform_indices = @transform_2, window_bounds = array<i64: 8, 8>}, {pipeline_mode = #tpu.pipeline_mode<synchronous>, transform_indices = @transform_3, window_bounds = array<i64: 1, 32>}, {pipeline_mode = #tpu.pipeline_mode<synchronous>, transform_indices = @transform_4, window_bounds = array<i64: 1, 32>}, {pipeline_mode = #tpu.pipeline_mode<synchronous>, transform_indices = @transform_5, window_bounds = array<i64: 32, 96>}, {pipeline_mode = #tpu.pipeline_mode<synchronous>, transform_indices = @transform_6, window_bounds = array<i64: 1, 96>}, {pipeline_mode = #tpu.pipeline_mode<synchronous>, transform_indices = @transform_7, window_bounds = array<i64: 32, 32>}, {pipeline_mode = #tpu.pipeline_mode<synchronous>, transform_indices = @transform_8, window_bounds = array<i64: 1, 32>}, {pipeline_mode = #tpu.pipeline_mode<synchronous>, transform_indices = @transform_9, window_bounds = array<i64: 1, 32>}, {pipeline_mode = #tpu.pipeline_mode<synchronous>, transform_indices = @transform_10, window_bounds = array<i64: 1, 32>}, {pipeline_mode = #tpu.pipeline_mode<synchronous>, transform_indices = @transform_11, window_bounds = array<i64: 32, 64>}, {pipeline_mode = #tpu.pipeline_mode<synchronous>, transform_indices = @transform_12, window_bounds = array<i64: 1, 64>}, {pipeline_mode = #tpu.pipeline_mode<synchronous>, transform_indices = @transform_13, window_bounds = array<i64: 64, 32>}, {pipeline_mode = #tpu.pipeline_mode<synchronous>, transform_indices = @transform_14, window_bounds = array<i64: 1, 32>}, {transform_indices = @transform_15, window_bounds = array<i64: 2, 8, 32>}]} {
    %c0 = arith.constant 0 : index
    %c0_0 = arith.constant 0 : index
    %c0_1 = arith.constant 0 : index
    %0 = vector.load %arg1[%c0, %c0_0, %c0_1] : memref<2x8x32xf32, #tpu.memory_space<vmem>>, vector<2x8x32xf32>
    %1 = vector.shape_cast %0 : vector<2x8x32xf32> to vector<16x32xf32>
    %c0_2 = arith.constant 0 : index
    %c0_3 = arith.constant 0 : index
    %2 = vector.load %arg3[%c0_2, %c0_3] : memref<8x8xf32, #tpu.memory_space<vmem>>, vector<8x8xf32>
    %c0_4 = arith.constant 0 : index
    %c0_5 = arith.constant 0 : index
    %c0_6 = arith.constant 0 : index
    %3 = vector.load %arg2[%c0_4, %c0_5, %c0_6] : memref<2x1x8xf32, #tpu.memory_space<vmem>>, vector<2x1x8xf32>
    %cst = arith.constant 5.000000e-01 : f32
    %4 = vector.broadcast %cst : f32 to vector<2x1x8xf32>
    %5 = arith.cmpf ogt, %3, %4 : vector<2x1x8xf32>
    %cst_7 = arith.constant -1.000000e+30 : f32
    %cst_8 = arith.constant 0.000000e+00 : f32
    %6 = vector.broadcast %cst_7 : f32 to vector<2x1x8xf32>
    %7 = vector.broadcast %cst_8 : f32 to vector<2x1x8xf32>
    %8 = arith.select %5, %6, %7 : vector<2x1x8xi1>, vector<2x1x8xf32>
    %9 = vector.shape_cast %2 : vector<8x8xf32> to vector<1x8x8xf32>
    %10 = vector.broadcast %9 : vector<1x8x8xf32> to vector<2x8x8xf32>
    %11 = vector.broadcast %8 : vector<2x1x8xf32> to vector<2x8x8xf32>
    %12 = arith.addf %10, %11 : vector<2x8x8xf32>
    %c0_9 = arith.constant 0 : index
    %c0_10 = arith.constant 0 : index
    %13 = vector.load %arg4[%c0_9, %c0_10] : memref<1x32xf32, #tpu.memory_space<vmem>>, vector<1x32xf32>
    %c0_11 = arith.constant 0 : index
    %c0_12 = arith.constant 0 : index
    %14 = vector.load %arg5[%c0_11, %c0_12] : memref<1x32xf32, #tpu.memory_space<vmem>>, vector<1x32xf32>
    %cst_13 = arith.constant dense<0.000000e+00> : vector<16xf32>
    %15 = vector.multi_reduction <add>, %1, %cst_13 [1] : vector<16x32xf32> to vector<16xf32>
    %16 = vector.shape_cast %15 : vector<16xf32> to vector<16x1xf32>
    %cst_14 = arith.constant 3.200000e+01 : f32
    %17 = vector.broadcast %cst_14 : f32 to vector<16x1xf32>
    %18 = arith.divf %16, %17 : vector<16x1xf32>
    %19 = vector.broadcast %18 : vector<16x1xf32> to vector<16x32xf32>
    %20 = arith.subf %1, %19 : vector<16x32xf32>
    %21 = arith.mulf %20, %20 : vector<16x32xf32>
    %cst_15 = arith.constant dense<0.000000e+00> : vector<16xf32>
    %22 = vector.multi_reduction <add>, %21, %cst_15 [1] : vector<16x32xf32> to vector<16xf32>
    %23 = vector.shape_cast %22 : vector<16xf32> to vector<16x1xf32>
    %cst_16 = arith.constant 3.200000e+01 : f32
    %24 = vector.broadcast %cst_16 : f32 to vector<16x1xf32>
    %25 = arith.divf %23, %24 : vector<16x1xf32>
    %26 = vector.broadcast %18 : vector<16x1xf32> to vector<16x32xf32>
    %27 = arith.subf %1, %26 : vector<16x32xf32>
    %cst_17 = arith.constant 9.99999974E-6 : f32
    %28 = vector.broadcast %cst_17 : f32 to vector<16x1xf32>
    %29 = arith.addf %25, %28 : vector<16x1xf32>
    %30 = math.rsqrt %29 : vector<16x1xf32>
    %31 = vector.broadcast %30 : vector<16x1xf32> to vector<16x32xf32>
    %32 = arith.mulf %27, %31 : vector<16x32xf32>
    %33 = vector.broadcast %13 : vector<1x32xf32> to vector<16x32xf32>
    %34 = arith.mulf %32, %33 : vector<16x32xf32>
    %35 = vector.broadcast %14 : vector<1x32xf32> to vector<16x32xf32>
    %36 = arith.addf %34, %35 : vector<16x32xf32>
    %37 = arith.truncf %36 : vector<16x32xf32> to vector<16x32xbf16>
    %c0_18 = arith.constant 0 : index
    %c0_19 = arith.constant 0 : index
    %38 = vector.load %arg6[%c0_18, %c0_19] : memref<32x96xbf16, #tpu.memory_space<vmem>>, vector<32x96xbf16>
    %cst_20 = arith.constant dense<0.000000e+00> : vector<16x96xf32>
    %39 = tpu.matmul %37, %38, %cst_20 {dimension_numbers = #tpu.dot_dimension_numbers<[1], [0], [0], [1], [0, 0, 1, 1], [], []>} : vector<16x32xbf16>, vector<32x96xbf16>, vector<16x96xf32> -> vector<16x96xf32>
    %c0_21 = arith.constant 0 : index
    %c0_22 = arith.constant 0 : index
    %40 = vector.load %arg7[%c0_21, %c0_22] : memref<1x96xf32, #tpu.memory_space<vmem>>, vector<1x96xf32>
    %41 = vector.broadcast %40 : vector<1x96xf32> to vector<16x96xf32>
    %42 = arith.addf %39, %41 : vector<16x96xf32>
    %43 = vector.extract_strided_slice %42 {offsets = [0, 0], sizes = [16, 32], strides = [1, 1]} : vector<16x96xf32> to vector<16x32xf32>
    %cst_23 = arith.constant 0.353553385 : f32
    %44 = vector.broadcast %cst_23 : f32 to vector<16x32xf32>
    %45 = arith.mulf %43, %44 : vector<16x32xf32>
    %46 = vector.extract_strided_slice %42 {offsets = [0, 32], sizes = [16, 32], strides = [1, 1]} : vector<16x96xf32> to vector<16x32xf32>
    %47 = vector.extract_strided_slice %42 {offsets = [0, 64], sizes = [16, 32], strides = [1, 1]} : vector<16x96xf32> to vector<16x32xf32>
    %48 = vector.extract_strided_slice %45 {offsets = [0, 0], sizes = [8, 32], strides = [1, 1]} : vector<16x32xf32> to vector<8x32xf32>
    %49 = vector.shape_cast %48 : vector<8x32xf32> to vector<8x4x8xf32>
    %50 = tpu.transpose %49, [1, 0, 2] : vector<8x4x8xf32> -> vector<4x8x8xf32>
    %51 = arith.truncf %50 : vector<4x8x8xf32> to vector<4x8x8xbf16>
    %52 = vector.extract_strided_slice %46 {offsets = [0, 0], sizes = [8, 32], strides = [1, 1]} : vector<16x32xf32> to vector<8x32xf32>
    %53 = vector.shape_cast %52 : vector<8x32xf32> to vector<8x4x8xf32>
    %54 = tpu.transpose %53, [1, 0, 2] : vector<8x4x8xf32> -> vector<4x8x8xf32>
    %55 = arith.truncf %54 : vector<4x8x8xf32> to vector<4x8x8xbf16>
    %56 = vector.extract_strided_slice %47 {offsets = [0, 0], sizes = [8, 32], strides = [1, 1]} : vector<16x32xf32> to vector<8x32xf32>
    %57 = vector.shape_cast %56 : vector<8x32xf32> to vector<8x4x8xf32>
    %58 = tpu.transpose %57, [1, 0, 2] : vector<8x4x8xf32> -> vector<4x8x8xf32>
    %59 = arith.truncf %58 : vector<4x8x8xf32> to vector<4x8x8xbf16>
    "tpu.trace_start"() <{level = 10 : i32, message = "nqd,nkd->nqk"}> : () -> ()
    %cst_24 = arith.constant dense<0.000000e+00> : vector<4x8x8xf32>
    %60 = tpu.matmul %51, %55, %cst_24 {dimension_numbers = #tpu.dot_dimension_numbers<[2], [2], [1], [1], [0, 0, 0, 1, 1, 1], [0], [0]>} : vector<4x8x8xbf16>, vector<4x8x8xbf16>, vector<4x8x8xf32> -> vector<4x8x8xf32>
    "tpu.trace_stop"() : () -> ()
    %61 = vector.extract_strided_slice %12 {offsets = [0, 0, 0], sizes = [1, 8, 8], strides = [1, 1, 1]} : vector<2x8x8xf32> to vector<1x8x8xf32>
    %62 = vector.shape_cast %61 : vector<1x8x8xf32> to vector<8x8xf32>
    %63 = vector.shape_cast %62 : vector<8x8xf32> to vector<1x8x8xf32>
    %64 = vector.broadcast %63 : vector<1x8x8xf32> to vector<4x8x8xf32>
    %65 = arith.addf %60, %64 : vector<4x8x8xf32>
    %cst_25 = arith.constant dense<0xFF800000> : vector<4x8xf32>
    %66 = vector.multi_reduction <maximumf>, %65, %cst_25 [2] : vector<4x8x8xf32> to vector<4x8xf32>
    %67 = vector.shape_cast %66 : vector<4x8xf32> to vector<4x8x1xf32>
    %68 = vector.broadcast %67 : vector<4x8x1xf32> to vector<4x8x8xf32>
    %69 = arith.subf %65, %68 : vector<4x8x8xf32>
    %70 = math.exp %69 : vector<4x8x8xf32>
    %cst_26 = arith.constant dense<0.000000e+00> : vector<4x8xf32>
    %71 = vector.multi_reduction <add>, %70, %cst_26 [2] : vector<4x8x8xf32> to vector<4x8xf32>
    %72 = vector.shape_cast %71 : vector<4x8xf32> to vector<4x8x1xf32>
    %73 = tpu.reciprocal %72 {approx = true} : vector<4x8x1xf32> -> vector<4x8x1xf32>
    %74 = vector.broadcast %73 : vector<4x8x1xf32> to vector<4x8x8xf32>
    %75 = arith.mulf %70, %74 : vector<4x8x8xf32>
    %76 = arith.truncf %75 : vector<4x8x8xf32> to vector<4x8x8xbf16>
    "tpu.trace_start"() <{level = 10 : i32, message = "nqk,nkd->nqd"}> : () -> ()
    %cst_27 = arith.constant dense<0.000000e+00> : vector<4x8x8xf32>
    %77 = tpu.matmul %76, %59, %cst_27 {dimension_numbers = #tpu.dot_dimension_numbers<[2], [1], [1], [2], [0, 0, 0, 1, 1, 2], [0], [0]>} : vector<4x8x8xbf16>, vector<4x8x8xbf16>, vector<4x8x8xf32> -> vector<4x8x8xf32>
    "tpu.trace_stop"() : () -> ()
    %78 = tpu.transpose %77, [1, 0, 2] : vector<4x8x8xf32> -> vector<8x4x8xf32>
    %79 = vector.shape_cast %78 : vector<8x4x8xf32> to vector<8x32xf32>
    %80 = vector.extract_strided_slice %45 {offsets = [8, 0], sizes = [8, 32], strides = [1, 1]} : vector<16x32xf32> to vector<8x32xf32>
    %81 = vector.shape_cast %80 : vector<8x32xf32> to vector<8x4x8xf32>
    %82 = tpu.transpose %81, [1, 0, 2] : vector<8x4x8xf32> -> vector<4x8x8xf32>
    %83 = arith.truncf %82 : vector<4x8x8xf32> to vector<4x8x8xbf16>
    %84 = vector.extract_strided_slice %46 {offsets = [8, 0], sizes = [8, 32], strides = [1, 1]} : vector<16x32xf32> to vector<8x32xf32>
    %85 = vector.shape_cast %84 : vector<8x32xf32> to vector<8x4x8xf32>
    %86 = tpu.transpose %85, [1, 0, 2] : vector<8x4x8xf32> -> vector<4x8x8xf32>
    %87 = arith.truncf %86 : vector<4x8x8xf32> to vector<4x8x8xbf16>
    %88 = vector.extract_strided_slice %47 {offsets = [8, 0], sizes = [8, 32], strides = [1, 1]} : vector<16x32xf32> to vector<8x32xf32>
    %89 = vector.shape_cast %88 : vector<8x32xf32> to vector<8x4x8xf32>
    %90 = tpu.transpose %89, [1, 0, 2] : vector<8x4x8xf32> -> vector<4x8x8xf32>
    %91 = arith.truncf %90 : vector<4x8x8xf32> to vector<4x8x8xbf16>
    "tpu.trace_start"() <{level = 10 : i32, message = "nqd,nkd->nqk"}> : () -> ()
    %cst_28 = arith.constant dense<0.000000e+00> : vector<4x8x8xf32>
    %92 = tpu.matmul %83, %87, %cst_28 {dimension_numbers = #tpu.dot_dimension_numbers<[2], [2], [1], [1], [0, 0, 0, 1, 1, 1], [0], [0]>} : vector<4x8x8xbf16>, vector<4x8x8xbf16>, vector<4x8x8xf32> -> vector<4x8x8xf32>
    "tpu.trace_stop"() : () -> ()
    %93 = vector.extract_strided_slice %12 {offsets = [1, 0, 0], sizes = [1, 8, 8], strides = [1, 1, 1]} : vector<2x8x8xf32> to vector<1x8x8xf32>
    %94 = vector.shape_cast %93 : vector<1x8x8xf32> to vector<8x8xf32>
    %95 = vector.shape_cast %94 : vector<8x8xf32> to vector<1x8x8xf32>
    %96 = vector.broadcast %95 : vector<1x8x8xf32> to vector<4x8x8xf32>
    %97 = arith.addf %92, %96 : vector<4x8x8xf32>
    %cst_29 = arith.constant dense<0xFF800000> : vector<4x8xf32>
    %98 = vector.multi_reduction <maximumf>, %97, %cst_29 [2] : vector<4x8x8xf32> to vector<4x8xf32>
    %99 = vector.shape_cast %98 : vector<4x8xf32> to vector<4x8x1xf32>
    %100 = vector.broadcast %99 : vector<4x8x1xf32> to vector<4x8x8xf32>
    %101 = arith.subf %97, %100 : vector<4x8x8xf32>
    %102 = math.exp %101 : vector<4x8x8xf32>
    %cst_30 = arith.constant dense<0.000000e+00> : vector<4x8xf32>
    %103 = vector.multi_reduction <add>, %102, %cst_30 [2] : vector<4x8x8xf32> to vector<4x8xf32>
    %104 = vector.shape_cast %103 : vector<4x8xf32> to vector<4x8x1xf32>
    %105 = tpu.reciprocal %104 {approx = true} : vector<4x8x1xf32> -> vector<4x8x1xf32>
    %106 = vector.broadcast %105 : vector<4x8x1xf32> to vector<4x8x8xf32>
    %107 = arith.mulf %102, %106 : vector<4x8x8xf32>
    %108 = arith.truncf %107 : vector<4x8x8xf32> to vector<4x8x8xbf16>
    "tpu.trace_start"() <{level = 10 : i32, message = "nqk,nkd->nqd"}> : () -> ()
    %cst_31 = arith.constant dense<0.000000e+00> : vector<4x8x8xf32>
    %109 = tpu.matmul %108, %91, %cst_31 {dimension_numbers = #tpu.dot_dimension_numbers<[2], [1], [1], [2], [0, 0, 0, 1, 1, 2], [0], [0]>} : vector<4x8x8xbf16>, vector<4x8x8xbf16>, vector<4x8x8xf32> -> vector<4x8x8xf32>
    "tpu.trace_stop"() : () -> ()
    %110 = tpu.transpose %109, [1, 0, 2] : vector<4x8x8xf32> -> vector<8x4x8xf32>
    %111 = vector.shape_cast %110 : vector<8x4x8xf32> to vector<8x32xf32>
    %112 = tpu.concatenate %79, %111 in 0 : vector<8x32xf32>, vector<8x32xf32> -> vector<16x32xf32>
    %113 = arith.truncf %112 : vector<16x32xf32> to vector<16x32xbf16>
    %c0_32 = arith.constant 0 : index
    %c0_33 = arith.constant 0 : index
    %114 = vector.load %arg8[%c0_32, %c0_33] : memref<32x32xbf16, #tpu.memory_space<vmem>>, vector<32x32xbf16>
    %cst_34 = arith.constant dense<0.000000e+00> : vector<16x32xf32>
    %115 = tpu.matmul %113, %114, %cst_34 {dimension_numbers = #tpu.dot_dimension_numbers<[1], [0], [0], [1], [0, 0, 1, 1], [], []>} : vector<16x32xbf16>, vector<32x32xbf16>, vector<16x32xf32> -> vector<16x32xf32>
    %c0_35 = arith.constant 0 : index
    %c0_36 = arith.constant 0 : index
    %116 = vector.load %arg9[%c0_35, %c0_36] : memref<1x32xf32, #tpu.memory_space<vmem>>, vector<1x32xf32>
    %117 = vector.broadcast %116 : vector<1x32xf32> to vector<16x32xf32>
    %118 = arith.addf %115, %117 : vector<16x32xf32>
    %119 = arith.addf %1, %118 : vector<16x32xf32>
    %c0_37 = arith.constant 0 : index
    %c0_38 = arith.constant 0 : index
    %120 = vector.load %arg10[%c0_37, %c0_38] : memref<1x32xf32, #tpu.memory_space<vmem>>, vector<1x32xf32>
    %c0_39 = arith.constant 0 : index
    %c0_40 = arith.constant 0 : index
    %121 = vector.load %arg11[%c0_39, %c0_40] : memref<1x32xf32, #tpu.memory_space<vmem>>, vector<1x32xf32>
    %cst_41 = arith.constant dense<0.000000e+00> : vector<16xf32>
    %122 = vector.multi_reduction <add>, %119, %cst_41 [1] : vector<16x32xf32> to vector<16xf32>
    %123 = vector.shape_cast %122 : vector<16xf32> to vector<16x1xf32>
    %cst_42 = arith.constant 3.200000e+01 : f32
    %124 = vector.broadcast %cst_42 : f32 to vector<16x1xf32>
    %125 = arith.divf %123, %124 : vector<16x1xf32>
    %126 = vector.broadcast %125 : vector<16x1xf32> to vector<16x32xf32>
    %127 = arith.subf %119, %126 : vector<16x32xf32>
    %128 = arith.mulf %127, %127 : vector<16x32xf32>
    %cst_43 = arith.constant dense<0.000000e+00> : vector<16xf32>
    %129 = vector.multi_reduction <add>, %128, %cst_43 [1] : vector<16x32xf32> to vector<16xf32>
    %130 = vector.shape_cast %129 : vector<16xf32> to vector<16x1xf32>
    %cst_44 = arith.constant 3.200000e+01 : f32
    %131 = vector.broadcast %cst_44 : f32 to vector<16x1xf32>
    %132 = arith.divf %130, %131 : vector<16x1xf32>
    %133 = vector.broadcast %125 : vector<16x1xf32> to vector<16x32xf32>
    %134 = arith.subf %119, %133 : vector<16x32xf32>
    %cst_45 = arith.constant 9.99999974E-6 : f32
    %135 = vector.broadcast %cst_45 : f32 to vector<16x1xf32>
    %136 = arith.addf %132, %135 : vector<16x1xf32>
    %137 = math.rsqrt %136 : vector<16x1xf32>
    %138 = vector.broadcast %137 : vector<16x1xf32> to vector<16x32xf32>
    %139 = arith.mulf %134, %138 : vector<16x32xf32>
    %140 = vector.broadcast %120 : vector<1x32xf32> to vector<16x32xf32>
    %141 = arith.mulf %139, %140 : vector<16x32xf32>
    %142 = vector.broadcast %121 : vector<1x32xf32> to vector<16x32xf32>
    %143 = arith.addf %141, %142 : vector<16x32xf32>
    %144 = arith.truncf %143 : vector<16x32xf32> to vector<16x32xbf16>
    %c0_46 = arith.constant 0 : index
    %c0_47 = arith.constant 0 : index
    %145 = vector.load %arg12[%c0_46, %c0_47] : memref<32x64xbf16, #tpu.memory_space<vmem>>, vector<32x64xbf16>
    %cst_48 = arith.constant dense<0.000000e+00> : vector<16x64xf32>
    %146 = tpu.matmul %144, %145, %cst_48 {dimension_numbers = #tpu.dot_dimension_numbers<[1], [0], [0], [1], [0, 0, 1, 1], [], []>} : vector<16x32xbf16>, vector<32x64xbf16>, vector<16x64xf32> -> vector<16x64xf32>
    %c0_49 = arith.constant 0 : index
    %c0_50 = arith.constant 0 : index
    %147 = vector.load %arg13[%c0_49, %c0_50] : memref<1x64xf32, #tpu.memory_space<vmem>>, vector<1x64xf32>
    %148 = vector.broadcast %147 : vector<1x64xf32> to vector<16x64xf32>
    %149 = arith.addf %146, %148 : vector<16x64xf32>
    %cst_51 = arith.constant 5.000000e-01 : f32
    %150 = vector.broadcast %cst_51 : f32 to vector<16x64xf32>
    %151 = arith.mulf %150, %149 : vector<16x64xf32>
    %cst_52 = arith.constant 0.707106769 : f32
    %152 = vector.broadcast %cst_52 : f32 to vector<16x64xf32>
    %153 = arith.mulf %149, %152 : vector<16x64xf32>
    %154 = math.erf %153 : vector<16x64xf32>
    %cst_53 = arith.constant 1.000000e+00 : f32
    %155 = vector.broadcast %cst_53 : f32 to vector<16x64xf32>
    %156 = arith.addf %155, %154 : vector<16x64xf32>
    %157 = arith.mulf %151, %156 : vector<16x64xf32>
    %158 = arith.truncf %157 : vector<16x64xf32> to vector<16x64xbf16>
    %c0_54 = arith.constant 0 : index
    %c0_55 = arith.constant 0 : index
    %159 = vector.load %arg14[%c0_54, %c0_55] : memref<64x32xbf16, #tpu.memory_space<vmem>>, vector<64x32xbf16>
    %cst_56 = arith.constant dense<0.000000e+00> : vector<16x32xf32>
    %160 = tpu.matmul %158, %159, %cst_56 {dimension_numbers = #tpu.dot_dimension_numbers<[1], [0], [0], [1], [0, 0, 1, 1], [], []>} : vector<16x64xbf16>, vector<64x32xbf16>, vector<16x32xf32> -> vector<16x32xf32>
    %c0_57 = arith.constant 0 : index
    %c0_58 = arith.constant 0 : index
    %161 = vector.load %arg15[%c0_57, %c0_58] : memref<1x32xf32, #tpu.memory_space<vmem>>, vector<1x32xf32>
    %162 = vector.broadcast %161 : vector<1x32xf32> to vector<16x32xf32>
    %163 = arith.addf %160, %162 : vector<16x32xf32>
    %164 = arith.addf %119, %163 : vector<16x32xf32>
    %165 = vector.shape_cast %164 : vector<16x32xf32> to vector<2x8x32xf32>
    %c0_59 = arith.constant 0 : index
    %c0_60 = arith.constant 0 : index
    %c0_61 = arith.constant 0 : index
    %166 = vector.load %arg16[%c0_59, %c0_60, %c0_61] : memref<2x8x32xf32, #tpu.memory_space<vmem>>, vector<2x8x32xf32>
    tpu.vector_store %arg16[%c0_59, %c0_60, %c0_61], %165 {strides = array<i32>} : memref<2x8x32xf32, #tpu.memory_space<vmem>>, vector<2x8x32xf32>,
    return
  }
  func.func @transform_0(%arg0: i32) -> (i32, i32, i32) {
    %c0_i32 = arith.constant 0 : i32
    %c0_i32_0 = arith.constant 0 : i32
    %c0_i32_1 = arith.constant 0 : i32
    return %arg0, %c0_i32, %c0_i32_0 : i32, i32, i32
  }
  func.func @transform_1(%arg0: i32) -> (i32, i32, i32) {
    %c0_i32 = arith.constant 0 : i32
    %c0_i32_0 = arith.constant 0 : i32
    %c0_i32_1 = arith.constant 0 : i32
    return %arg0, %c0_i32, %c0_i32_0 : i32, i32, i32
  }
  func.func @transform_2(%arg0: i32) -> (i32, i32) {
    %c0_i32 = arith.constant 0 : i32
    %c0_i32_0 = arith.constant 0 : i32
    %c0_i32_1 = arith.constant 0 : i32
    return %c0_i32, %c0_i32_0 : i32, i32
  }
  func.func @transform_3(%arg0: i32) -> (i32, i32) {
    %c0_i32 = arith.constant 0 : i32
    %c0_i32_0 = arith.constant 0 : i32
    %c0_i32_1 = arith.constant 0 : i32
    return %c0_i32, %c0_i32_0 : i32, i32
  }
  func.func @transform_4(%arg0: i32) -> (i32, i32) {
    %c0_i32 = arith.constant 0 : i32
    %c0_i32_0 = arith.constant 0 : i32
    %c0_i32_1 = arith.constant 0 : i32
    return %c0_i32, %c0_i32_0 : i32, i32
  }
  func.func @transform_5(%arg0: i32) -> (i32, i32) {
    %c0_i32 = arith.constant 0 : i32
    %c0_i32_0 = arith.constant 0 : i32
    %c0_i32_1 = arith.constant 0 : i32
    return %c0_i32, %c0_i32_0 : i32, i32
  }
  func.func @transform_6(%arg0: i32) -> (i32, i32) {
    %c0_i32 = arith.constant 0 : i32
    %c0_i32_0 = arith.constant 0 : i32
    %c0_i32_1 = arith.constant 0 : i32
    return %c0_i32, %c0_i32_0 : i32, i32
  }
  func.func @transform_7(%arg0: i32) -> (i32, i32) {
    %c0_i32 = arith.constant 0 : i32
    %c0_i32_0 = arith.constant 0 : i32
    %c0_i32_1 = arith.constant 0 : i32
    return %c0_i32, %c0_i32_0 : i32, i32
  }
  func.func @transform_8(%arg0: i32) -> (i32, i32) {
    %c0_i32 = arith.constant 0 : i32
    %c0_i32_0 = arith.constant 0 : i32
    %c0_i32_1 = arith.constant 0 : i32
    return %c0_i32, %c0_i32_0 : i32, i32
  }
  func.func @transform_9(%arg0: i32) -> (i32, i32) {
    %c0_i32 = arith.constant 0 : i32
    %c0_i32_0 = arith.constant 0 : i32
    %c0_i32_1 = arith.constant 0 : i32
    return %c0_i32, %c0_i32_0 : i32, i32
  }
  func.func @transform_10(%arg0: i32) -> (i32, i32) {
    %c0_i32 = arith.constant 0 : i32
    %c0_i32_0 = arith.constant 0 : i32
    %c0_i32_1 = arith.constant 0 : i32
    return %c0_i32, %c0_i32_0 : i32, i32
  }
  func.func @transform_11(%arg0: i32) -> (i32, i32) {
    %c0_i32 = arith.constant 0 : i32
    %c0_i32_0 = arith.constant 0 : i32
    %c0_i32_1 = arith.constant 0 : i32
    return %c0_i32, %c0_i32_0 : i32, i32
  }
  func.func @transform_12(%arg0: i32) -> (i32, i32) {
    %c0_i32 = arith.constant 0 : i32
    %c0_i32_0 = arith.constant 0 : i32
    %c0_i32_1 = arith.constant 0 : i32
    return %c0_i32, %c0_i32_0 : i32, i32
  }
  func.func @transform_13(%arg0: i32) -> (i32, i32) {
    %c0_i32 = arith.constant 0 : i32
    %c0_i32_0 = arith.constant 0 : i32
    %c0_i32_1 = arith.constant 0 : i32
    return %c0_i32, %c0_i32_0 : i32, i32
  }
  func.func @transform_14(%arg0: i32) -> (i32, i32) {
    %c0_i32 = arith.constant 0 : i32
    %c0_i32_0 = arith.constant 0 : i32
    %c0_i32_1 = arith.constant 0 : i32
    return %c0_i32, %c0_i32_0 : i32, i32
  }
  func.func @transform_15(%arg0: i32) -> (i32, i32, i32) {
    %c0_i32 = arith.constant 0 : i32
    %c0_i32_0 = arith.constant 0 : i32
    %c0_i32_1 = arith.constant 0 : i32
    return %arg0, %c0_i32, %c0_i32_0 : i32, i32, i32
  }
}

</mosaic_0001>

<bundles_post_ra>
// kernel: tpu_custom_call.1
= control target key start
LH: loop header
LB: loop body
LE: loop exit
PB: predicated region body
PF: predicated region fallthrough
CT: control target
= control target key end

     0   :  { %20 = vsyncpa [#allocation3], 0  ;;  %s3619_s0 = inlined_call_operand.vmem [shape: f32[2,8,32], index: 0, kind: input, shape index: {}]   ;;  %s3620_s1 = inlined_call_operand.hbm [shape: f32[2,1,8], index: 1, kind: input, shape index: {}]   ;;  %s3621_s2 = inlined_call_operand.hbm [shape: f32[8,8], index: 2, kind: input, shape index: {}]   ;;  %s3622_s3 = inlined_call_operand.vmem [shape: f32[1,32], index: 3, kind: input, shape index: {}]   ;;  %s3623_s4 = inlined_call_operand.vmem [shape: f32[1,32], index: 4, kind: input, shape index: {}]   ;;  %s3624_s5 = inlined_call_operand.vmem [shape: bf16[32,96], index: 5, kind: input, shape index: {}]   ;;  %s3625_s6 = inlined_call_operand.vmem [shape: f32[1,96], index: 6, kind: input, shape index: {}]   ;;  %s3626_s7 = inlined_call_operand.vmem [shape: bf16[32,32], index: 7, kind: input, shape index: {}]   ;;  %s3627_s8 = inlined_call_operand.vmem [shape: f32[1,32], index: 8, kind: input, shape index: {}]   ;;  %s3628_s9 = inlined_call_operand.vmem [shape: f32[1,32], index: 9, kind: input, shape index: {}]   ;;  %s3629_s10 = inlined_call_operand.vmem [shape: f32[1,32], index: 10, kind: input, shape index: {}]   ;;  %s3630_s11 = inlined_call_operand.hbm [shape: bf16[32,64], index: 11, kind: input, shape index: {}]   ;;  %s3631_s12 = inlined_call_operand.vmem [shape: f32[1,64], index: 12, kind: input, shape index: {}]   ;;  %s3632_s13 = inlined_call_operand.vmem [shape: bf16[64,32], index: 13, kind: input, shape index: {}]   ;;  %s3633_s14 = inlined_call_operand.vmem [shape: f32[1,32], index: 14, kind: input, shape index: {}]   ;;  %s3634_s15 = inlined_call_operand.hbm [shape: f32[2,8,32], index: 15, kind: output, shape index: {}]  }
   0x1   :  { %21 = vsyncpa [#allocation6], 0 }
   0x2   :  { %22 = vsyncpa [#allocation4], 0  ;;  %s2997_s18 = smov [#allocation5]   ;;  %s2998_s20 = smov [#allocation2]  }
   0x3   :  { %s43_s19 = sshll.u32 %s2997_s18, 4  ;;  %s30_s21 = sshll.u32 %s2998_s20, 4  ;;  %s44_s19 = int_to_ptr.vmem [resolvable:$true] %s43_s19  ;;  %s31_s21 = int_to_ptr.vmem [resolvable:$true] %s30_s21 }
   0x4   :  { %s2919_s22 = scalar_lea.vmem %s44_s19, 128  ;;  %p2924_p1 = scmp.lt.s32.totalorder %s44_s19, %s44_s19 }
   0x5   :  { %p2920_p0 = scmp.ne.s32.totalorder %s44_s19, %s2919_s22  ;;  %p2925_p2 = scmp.lt.s32.totalorder %s2919_s22, %s2919_s22 }
   0x7   :  { %p2926_p3 = por %p2925_p2, %p2924_p1 }
   0x9   :  { %p2927_p4 = pnand %p2926_p3, %p2920_p0 }
   0xb   :  { %2930 = shalt.err (!%p2927_p4)
}
   0xc   :  { %46 = dma.hbm_to_vmem [thread:$0]  %s3621_s2, 128, %s44_s19, [#allocation6]  }
   0xd   :  { %s2939_s25 = scalar_lea.vmem %s31_s21, 32  ;;  %p2944_p6 = scmp.lt.s32.totalorder %s31_s21, %s31_s21 }
   0xe   :  { %p2940_p5 = scmp.ne.s32.totalorder %s31_s21, %s2939_s25  ;;  %p2945_p7 = scmp.lt.s32.totalorder %s2939_s25, %s2939_s25 }
  0x10   :  { %p2946_p8 = por %p2945_p7, %p2944_p6 }
  0x12   :  { %p2947_p9 = pnand %p2946_p8, %p2940_p5 }
  0x14   :  { %2950 = shalt.err (!%p2947_p9)
}
  0x15   :  { %s2999_s26 = smov 16   ;;  %s3000_s27 = smov 1  }
  0x16   :  { %36 = dma.hbm_to_vmem [thread:$0]  %s3620_s1, 32, %s31_s21, [#allocation3], %s2999_s26, %s2999_s26, %s3000_s27  }
  0x17   :  { %s3001_s30 = smov [#allocation7]  }
  0x18   :  { %s68_s16 = sshll.u32 %s3001_s30, 4  ;;  %s69_s16 = int_to_ptr.vmem [resolvable:$true] %s68_s16 }
  0x19   :  { %s2959_s17 = scalar_lea.vmem %s69_s16, 256  ;;  %p2964_p11 = scmp.lt.s32.totalorder %s69_s16, %s69_s16 }
  0x1a   :  { %p2960_p10 = scmp.ne.s32.totalorder %s69_s16, %s2959_s17  ;;  %p2965_p12 = scmp.lt.s32.totalorder %s2959_s17, %s2959_s17 }
  0x1c   :  { %p2966_p13 = por %p2965_p12, %p2964_p11 }
  0x1e   :  { %p2967_p0 = pnand %p2966_p13, %p2960_p10 }
  0x20   :  { %2970 = shalt.err (!%p2967_p0)
}
  0x21   :  { %s3002_s2 = smov 64   ;;  %s3003_s18 = smov 4  }
  0x22   :  { %74 = dma.hbm_to_vmem [thread:$0]  %s3630_s11, 256, %s69_s16, [#allocation6], %s3002_s2, %s3002_s2, %s3003_s18  }
  0x23   :  { %2991 = dma.done.wait [#allocation3], 32  }
  0x24   :  { %2992 = vsyncadd [#allocation3], 4294967264 }
  0x25   :  { %2993 = dma.done.wait [#allocation6], 384  }
  0x26   :  { %2994 = vsyncadd [#allocation6], 4294966912  ;;  %vm116_vm0 = vcmask 261120   ;;  %v91_v0 = vld [vmem:[%s3619_s0] sm:$0xff]  ;;  %v92_v1 = vld [vmem:[%s3619_s0 + $0x8] sm:$0xff]  ;;  %v3004_v15 = vmov 0.0   ;;  %v102_v45 = vlaneseq }
  0x27   :  { %v117_v2 = vsel %vm116_vm0, %v91_v0, 0.0  ;;  %v120_v3 = vsel %vm116_vm0, %v92_v1, 0.0  ;;  %v2855_v14 = vld [vmem:[%s3624_s5 + $0x8] sm:$0xff]   ;;  %2689 = vmatprep.subr.bf16.mxu0 %v3004_v15  ;;  %vm3005_vm1 = vmmov 0   ;;  %v2856_v16 = vld [vmem:[%s3624_s5] sm:$0xff]   ;;  %2697 = vmatprep.subr.bf16.mxu1 %v3004_v15  ;;  %s3008_s18 = smov 104  }
  0x28   :  { %118 = vadd.xlane.f32.xlu0 %v117_v2  ;;  %2693 = vmatprep.mubr.msk.bf16.mxu0 %vm3005_vm1, %v3004_v15  ;;  %v2589_v25 = vld [vmem:[%s3622_s3] ss:$0 sm:$0xff]  ;;  %s3006_s3 = smov 112   ;;  %v3010_v46 = vmov 1983009808   ;;  %v3173_v51 = vshrl.u32 %v102_v45, 7 }
  0x29   :  { %2690 = vmatpush3.bf16.msra.mxu0 %v2855_v14  ;;  %2699 = vmatprep.mubr.msk.bf16.mxu1 %vm3005_vm1, %v3004_v15  ;;  %v2590_v29 = vld [vmem:[%s3623_s4] ss:$0 sm:$0xff]  ;;  %s3007_s4 = smov 120   ;;  %v243_v47 = vunpack.c.l.s4 %v3010_v46  ;;  %v3011_v49 = vmov 1934713408   ;;  %vm691_vm2 = vcmask 64512  }
  0x2a   :  { %2691 = vmatprep.subr.bf16.mxu0 %v3004_v15  ;;  %v2591_v34 = vld [vmem:[%s3625_s6] ss:$0 sm:$0xff]  ;;  %s3009_s6 = smov 96   ;;  %v275_v50 = vunpack.c.l.s4 %v3011_v49  ;;  %vm927_vm4 = vcmask 1043456   ;;  %s3013_s21 = smov 24   ;;  %vm1258_vm6 = vcmask 130048  }
  0x2b   :  { %v244_v52 = vunpack.c.0.s8 %v243_v47  ;;  %vm1260_vm7 = vcmask 195584   ;;  %vm2522_vm8 = vcmask 523264  }
  0x2c   :  { %121 = vadd.xlane.f32.xlu0 %v120_v3  ;;  %v276_v55 = vunpack.c.0.s8 %v275_v50 }
  0x2d   :  { %2692 = vmatpush3.bf16.msra.mxu0 %v2856_v16  ;;  %v3176_v56 = vsub.s32 %v244_v52, %v3173_v51 }
  0x2e   :  { %2703 = vmatprep.subr.bf16.mxu0 %v3004_v15  ;;  %v3179_v63 = vsub.s32 %v276_v55, %v3173_v51 }
  0xb1   :  { %v119_v4 = vpop.xlane.xlu0 %118 }
  0xb2   :  { %v124_v5 = vmul.f32 0.03125, %v119_v4 }
  0xb4   :  { %v126_v6 = vsub.f32 %v91_v0, %v124_v5 }
  0xb5   :  { %v122_v7 = vpop.xlane.xlu0 %121 }
  0xb6   :  { %v125_v8 = vmul.f32 0.03125, %v122_v7  ;;  %v128_v9 = vmul.f32 %v126_v6, %v126_v6 }
  0xb8   :  { %v127_v10 = vsub.f32 %v92_v1, %v125_v8  ;;  %v130_v11 = vsel %vm116_vm0, %v128_v9, 0.0 }
  0xb9   :  { %131 = vadd.xlane.f32.xlu1 %v130_v11 }
  0xba   :  { %v129_v12 = vmul.f32 %v127_v10, %v127_v10 }
  0xbc   :  { %v133_v13 = vsel %vm116_vm0, %v129_v12, 0.0 }
  0xbd   :  { %134 = vadd.xlane.f32.xlu1 %v133_v13 }
 0x142   :  { %v132_v17 = vpop.xlane.xlu1 %131 }
 0x143   :  { %v136_v18 = vmul.f32 0.03125, %v132_v17 }
 0x145   :  { %v138_v19 = vadd.f32 1e-05, %v136_v18 }
 0x146   :  { %v135_v20 = vpop.xlane.xlu1 %134 }
 0x147   :  { %2865 = vrsqrt.f32 %v138_v19  ;;  %v137_v21 = vmul.f32 0.03125, %v135_v20 }
 0x149   :  { %v139_v22 = vadd.f32 1e-05, %v137_v21 }
 0x14b   :  { %2867 = vrsqrt.f32 %v139_v22 }
 0x154   :  { %v2866_v23 = vpop.eup %2865 }
 0x155   :  { %v142_v24 = vmul.f32 %v2866_v23, %v126_v6 }
 0x157   :  { %v150_v28 = vmul.f32 %v2589_v25, %v142_v24 }
 0x158   :  { %v2868_v26 = vpop.eup %2867 }
 0x159   :  { %v143_v27 = vmul.f32 %v2868_v26, %v127_v10  ;;  %v158_v31 = vadd.f32 %v2590_v29, %v150_v28 }
 0x15b   :  { %v151_v30 = vmul.f32 %v2589_v25, %v143_v27 }
 0x15d   :  { %v159_v32 = vadd.f32 %v2590_v29, %v151_v30 }
 0x15f   :  { %v160_v33 = vpack.c.bf16 %v159_v32, %v158_v31 }
 0x161   :  { %2694 = vmatmul.mubr.msk.bf16.vlgmr.msra.gmra.mxu0 %vm116_vm0, %v160_v33 }
 0x162   :  { %2705 = vmatprep.mubr.msk.bf16.mxu0 %vm3005_vm1, %v3004_v15 }
 0x221   :  { %v221_v35 = vpop.f32.mrf.mxu0 }
 0x222   :  { %v3145_v36 = vadd.f32 %v2591_v34, %v221_v35 }
 0x223   :  { %v2695_v37 = vpop.f32.mrf.mxu0 }
 0x224   :  { %383 = vrot.lane.b32.xlu1 %v3145_v36, %s3006_s3  ;;  %381 = vrot.lane.b32.xlu0 %v3145_v36, %s3007_s4  ;;  %v228_v43 = vmul.f32 0.35355338, %v3145_v36 }
 0x225   :  { %v224_v38 = vpop.f32.mrf.mxu0 }
 0x226   :  { %v3151_v39 = vadd.f32 %v2591_v34, %v224_v38 }
 0x227   :  { %v2696_v40 = vpop.f32.mrf.mxu0 }
 0x228   :  { %385 = vrot.lane.b32.xlu1 %v3145_v36, %s3008_s18 }
 0x22c   :  { %387 = vrot.lane.b32.xlu1 %v3145_v36, %s3009_s6 }
 0x296   :  { %v3157_v41 = vpop.permute.xlu1 %383  ;;  %v3159_v42 = vpop.permute.xlu0 %381 }
 0x297   :  { %391 = vrot.lane.b32.xlu1 %v3157_v41, %s3009_s6  ;;  %389 = vrot.lane.b32.xlu0 %v3159_v42, %s3009_s6 }
 0x29a   :  { %v3166_v44 = vpop.permute.xlu1 %385 }
 0x29b   :  { %393 = vrot.lane.b32.xlu0 %v3166_v44, %s3009_s6  ;;  %231 = vrot.lane.b32.xlu1 %v228_v43, %s3007_s4 }
 0x29e   :  { %v388_v48 = vpop.permute.xlu1 %387 }
 0x29f   :  { %234 = vrot.lane.b32.xlu0 %v228_v43, %s3006_s3  ;;  %237 = vrot.lane.b32.xlu1 %v228_v43, %s3008_s18 }
 0x309   :  { %v392_v53 = vpop.permute.xlu1 %391  ;;  %v390_v54 = vpop.permute.xlu0 %389 }
 0x30a   :  { %v399_v57 = vcombine.low %v388_v48, %v392_v53  ;;  %v400_v58 = vcombine.high %v388_v48, %v392_v53 }
 0x30c   :  { %v407_v0 = vrot.slane %v399_v57, %v3176_v56  ;;  %v414_v1 = vrot.slane %v400_v58, %v3176_v56 }
 0x30d   :  { %v394_v59 = vpop.permute.xlu0 %393  ;;  %v232_v60 = vpop.permute.xlu1 %231 }
 0x30e   :  { %v415_v61 = vcombine.low %v390_v54, %v394_v59  ;;  %v416_v62 = vcombine.high %v390_v54, %v394_v59 }
 0x310   :  { %v423_v2 = vrot.slane %v415_v61, %v3176_v56  ;;  %v430_v3 = vrot.slane %v416_v62, %v3176_v56 }
 0x311   :  { %v235_v4 = vpop.permute.xlu0 %234  ;;  %v238_v5 = vpop.permute.xlu1 %237 }
 0x312   :  { %v431_v6 = vcombine.low %v407_v0, %v423_v2  ;;  %v432_v7 = vcombine.high %v407_v0, %v423_v2  ;;  %v447_v8 = vcombine.low %v414_v1, %v430_v3  ;;  %v448_v9 = vcombine.high %v414_v1, %v430_v3 }
 0x313   :  { %v240_v10 = vcombine.low %v228_v43, %v235_v4  ;;  %v241_v11 = vcombine.high %v228_v43, %v235_v4  ;;  %v256_v12 = vcombine.low %v232_v60, %v238_v5  ;;  %v257_v13 = vcombine.high %v232_v60, %v238_v5 }
 0x314   :  { %v439_v14 = vrot.slane %v431_v6, %v3179_v63  ;;  %v446_v16 = vrot.slane %v432_v7, %v3179_v63  ;;  %v455_v17 = vrot.slane %v447_v8, %v3179_v63  ;;  %v462_v18 = vrot.slane %v448_v9, %v3179_v63 }
 0x315   :  { %v248_v19 = vrot.slane %v240_v10, %v3176_v56  ;;  %v255_v20 = vrot.slane %v241_v11, %v3176_v56  ;;  %v264_v21 = vrot.slane %v256_v12, %v3176_v56  ;;  %v271_v22 = vrot.slane %v257_v13, %v3176_v56 }
 0x316   :  { %v467_v23 = vcombine.low %v439_v14, %v446_v16  ;;  %v2597_v24 = vcombine.high %v439_v14, %v446_v16  ;;  %v483_v25 = vcombine.low %v455_v17, %v462_v18  ;;  %v2598_v26 = vcombine.high %v455_v17, %v462_v18 }
 0x317   :  { %v272_v27 = vcombine.low %v248_v19, %v264_v21  ;;  %v273_v28 = vcombine.high %v248_v19, %v264_v21  ;;  %v288_v29 = vcombine.low %v255_v20, %v271_v22  ;;  %v289_v30 = vcombine.high %v255_v20, %v271_v22 }
 0x318   :  { %v474_v31 = vrot.slane %v467_v23, %v3176_v56  ;;  %v482_v32 = vrot.slane %v2597_v24, %v3176_v56  ;;  %v490_v33 = vrot.slane %v483_v25, %v3176_v56  ;;  %v498_v34 = vrot.slane %v2598_v26, %v3176_v56 }
 0x319   :  { %v280_v35 = vrot.slane %v272_v27, %v3179_v63  ;;  %v287_v37 = vrot.slane %v273_v28, %v3179_v63  ;;  %v296_v38 = vrot.slane %v288_v29, %v3179_v63  ;;  %v303_v40 = vrot.slane %v289_v30, %v3179_v63  ;;  %v94_v28 = vld [vmem:[#allocation2] sm:$0x1] }
 0x31a   :  { %v499_v43 = vcombine.low %v474_v31, %v482_v32  ;;  %v515_v45 = vcombine.low %v490_v33, %v498_v34  ;;  %v500_v46 = vcombine.high %v474_v31, %v482_v32  ;;  %v516_v47 = vcombine.high %v490_v33, %v498_v34  ;;  %v3237_v32 = vld [vmem:[#allocation5] sm:$0xff] }
 0x31b   :  { %v308_v48 = vcombine.low %v280_v35, %v287_v37  ;;  %v2595_v49 = vcombine.high %v280_v35, %v287_v37  ;;  %v324_v50 = vcombine.low %v296_v38, %v303_v40  ;;  %v2596_v52 = vcombine.high %v296_v38, %v303_v40 }
 0x31c   :  { %v507_v53 = vrot.slane %v499_v43, %v3179_v63  ;;  %v523_v54 = vrot.slane %v515_v45, %v3179_v63  ;;  %v514_v62 = vrot.slane %v500_v46, %v3179_v63  ;;  %v530_v0 = vrot.slane %v516_v47, %v3179_v63 }
 0x31d   :  { %v315_v55 = vrot.slane %v308_v48, %v3176_v56  ;;  %v323_v57 = vrot.slane %v2595_v49, %v3176_v56  ;;  %v331_v58 = vrot.slane %v324_v50, %v3176_v56  ;;  %v339_v59 = vrot.slane %v2596_v52, %v3176_v56 }
 0x31e   :  { %v531_v60 = vcombine.low %v507_v53, %v523_v54  ;;  %v532_v61 = vcombine.high %v507_v53, %v523_v54  ;;  %v533_v9 = vcombine.low %v514_v62, %v530_v0  ;;  %v534_v10 = vcombine.high %v514_v62, %v530_v0 }
 0x31f   :  { %v340_v1 = vcombine.low %v315_v55, %v323_v57  ;;  %v356_v2 = vcombine.low %v331_v58, %v339_v59  ;;  %v341_v11 = vcombine.high %v315_v55, %v323_v57  ;;  %v357_v12 = vcombine.high %v331_v58, %v339_v59 }
 0x320   :  { %v535_v3 = vpack.c.bf16 %v531_v60, %v531_v60  ;;  %v536_v4 = vpack.c.bf16 %v532_v61, %v532_v61  ;;  %v537_v16 = vpack.c.bf16 %v533_v9, %v533_v9  ;;  %v538_v17 = vpack.c.bf16 %v534_v10, %v534_v10 }
 0x321   :  { %v348_v5 = vrot.slane %v340_v1, %v3179_v63  ;;  %v364_v6 = vrot.slane %v356_v2, %v3179_v63  ;;  %v355_v20 = vrot.slane %v341_v11, %v3179_v63  ;;  %v371_v21 = vrot.slane %v357_v12, %v3179_v63 }
 0x322   :  { %v696_v7 = vsel %vm691_vm2, %v535_v3, 0  ;;  %v742_v8 = vsel %vm691_vm2, %v536_v4, 0  ;;  %v788_v22 = vsel %vm691_vm2, %v537_v16, 0  ;;  %v834_v23 = vsel %vm691_vm2, %v538_v17, 0 }
 0x323   :  { %2698 = vmatpush3.bf16.xpose.msra.mxu1 %v696_v7  ;;  %2704 = vmatpush3.bf16.xpose.msra.mxu0 %v742_v8  ;;  %v372_v13 = vcombine.low %v348_v5, %v364_v6  ;;  %v373_v14 = vcombine.high %v348_v5, %v364_v6  ;;  %v374_v24 = vcombine.low %v355_v20, %v371_v21  ;;  %vm96_vm3 = vcmp.gt.f32.partialorder %v94_v28, 0.5 }
 0x324   :  { %2709 = vmatprep.subr.bf16.mxu1 %v3004_v15  ;;  %2715 = vmatprep.subr.bf16.mxu0 %v3004_v15  ;;  %v375_v25 = vcombine.high %v355_v20, %v371_v21  ;;  %v104_v29 = vsub.s32 0, %v3173_v51  ;;  %v98_v30 = vsel %vm96_vm3, -1e+30, %v3004_v15 }
 0x325   :  { %v376_v18 = vpack.c.bf16 %v372_v13, %v372_v13  ;;  %v377_v19 = vpack.c.bf16 %v373_v14, %v373_v14  ;;  %v378_v26 = vpack.c.bf16 %v374_v24, %v374_v24  ;;  %v3281_v14 = vmul.f32 0.35355338, %v3151_v39 }
 0x326   :  { %v379_v27 = vpack.c.bf16 %v375_v25, %v375_v25  ;;  %v105_v31 = vrot.slane %v98_v30, %v104_v29 }
 0x328   :  { %v112_v33 = vadd.f32 %v105_v31, %v3237_v32 }
 0x32a   :  { %2700 = vmatmul.mubr.msk.bf16.vlgmr.msra.gmra.mxu1 %vm691_vm2, %v376_v18  ;;  %2706 = vmatmul.mubr.msk.bf16.vlgmr.msra.gmra.mxu0 %vm691_vm2, %v377_v19 }
 0x32b   :  { %2710 = vmatpush3.bf16.xpose.msra.mxu1 %v788_v22  ;;  %2716 = vmatpush3.bf16.xpose.msra.mxu0 %v834_v23 }
 0x32c   :  { %2711 = vmatprep.mubr.msk.bf16.mxu1 %vm3005_vm1, %v3004_v15  ;;  %2717 = vmatprep.mubr.msk.bf16.mxu0 %vm3005_vm1, %v3004_v15 }
 0x32d   :  { %2721 = vmatprep.subr.bf16.mxu1 %v3004_v15  ;;  %2727 = vmatprep.subr.bf16.mxu0 %v3004_v15 }
 0x332   :  { %2712 = vmatmul.mubr.msk.bf16.vlgmr.msra.gmra.mxu1 %vm691_vm2, %v378_v26  ;;  %2718 = vmatmul.mubr.msk.bf16.vlgmr.msra.gmra.mxu0 %vm691_vm2, %v379_v27 }
 0x333   :  { %2729 = vmatprep.mubr.msk.bf16.mxu0 %vm3005_vm1, %v3004_v15  ;;  %2723 = vmatprep.mubr.msk.bf16.mxu1 %vm3005_vm1, %v3004_v15 }
 0x3ea   :  { %v732_v34 = vpop.f32.mrf.mxu1  ;;  %v778_v35 = vpop.f32.mrf.mxu0 }
 0x3eb   :  { %v3240_v37 = vadd.f32 %v732_v34, %v112_v33  ;;  %v779_v38 = vadd.f32 %v778_v35, %v112_v33 }
 0x3ec   :  { %v2701_v40 = vpop.f32.mrf.mxu1  ;;  %v2707_v43 = vpop.f32.mrf.mxu0 }
 0x3ed   :  { %v876_v45 = vsel %vm691_vm2, %v3240_v37, -inf  ;;  %v879_v46 = vsel %vm691_vm2, %v779_v38, -inf }
 0x3ee   :  { %877 = vmax.xlane.f32.xlu0 %v876_v45  ;;  %v735_v47 = vpop.f32.mrf.mxu1  ;;  %880 = vmax.xlane.f32.xlu1 %v879_v46  ;;  %v781_v48 = vpop.f32.mrf.mxu0 }
 0x3f0   :  { %v2702_v49 = vpop.f32.mrf.mxu1  ;;  %v2708_v50 = vpop.f32.mrf.mxu0 }
 0x3f2   :  { %v824_v52 = vpop.f32.mrf.mxu1  ;;  %v870_v53 = vpop.f32.mrf.mxu0 }
 0x3f3   :  { %v3245_v54 = vadd.f32 %v824_v52, %v112_v33  ;;  %v871_v58 = vadd.f32 %v870_v53, %v112_v33 }
 0x3f4   :  { %v2713_v55 = vpop.f32.mrf.mxu1  ;;  %v2719_v57 = vpop.f32.mrf.mxu0 }
 0x3f5   :  { %v882_v59 = vsel %vm691_vm2, %v3245_v54, -inf  ;;  %v885_v1 = vsel %vm691_vm2, %v871_v58, -inf }
 0x3f6   :  { %883 = vmax.xlane.f32.xlu0 %v882_v59  ;;  %v827_v60 = vpop.f32.mrf.mxu1  ;;  %v873_v61 = vpop.f32.mrf.mxu0 }
 0x3f8   :  { %v2714_v62 = vpop.f32.mrf.mxu1  ;;  %v2720_v0 = vpop.f32.mrf.mxu0 }
 0x3fa   :  { %886 = vmax.xlane.f32.xlu0 %v885_v1 }
 0x3ff   :  { %1415 = vrot.lane.b32.xlu1 %v3151_v39, %s3006_s3 }
 0x403   :  { %1417 = vrot.lane.b32.xlu1 %v3151_v39, %s3008_s18 }
 0x407   :  { %541 = vrot.lane.b32.xlu1 %v3159_v42, %s3002_s2 }
 0x40b   :  { %543 = vrot.lane.b32.xlu1 %v3157_v41, %s3002_s2 }
 0x410   :  { %1413 = vrot.lane.b32.xlu0 %v3151_v39, %s3007_s4 }
 0x414   :  { %539 = vrot.lane.b32.xlu0 %v3145_v36, %s3002_s2 }
 0x418   :  { %545 = vrot.lane.b32.xlu0 %v3166_v44, %s3002_s2 }
 0x41c   :  { %1419 = vrot.lane.b32.xlu0 %v3151_v39, %s3009_s6 }
 0x477   :  { %v881_v2 = vpop.xlane.xlu1 %880  ;;  %v878_v3 = vpop.xlane.xlu0 %877 }
 0x478   :  { %v889_v6 = vsub.f32 %v779_v38, %v881_v2  ;;  %v888_v48 = vsub.f32 %v3240_v37, %v878_v3 }
 0x47a   :  { %v894_v44 = vmul.f32 1.442695, %v889_v6  ;;  %v892_v62 = vmul.f32 1.442695, %v888_v48 }
 0x47b   :  { %v3266_v4 = vpop.permute.xlu1 %1415 }
 0x47c   :  { %2869 = vpow2.f32 %v894_v44 }
 0x47f   :  { %v3268_v42 = vpop.xlane.xlu0 %883  ;;  %v3270_v5 = vpop.permute.xlu1 %1417 }
 0x480   :  { %1425 = vrot.lane.b32.xlu0 %v3270_v5, %s3009_s6  ;;  %v890_v37 = vsub.f32 %v3245_v54, %v3268_v42 }
 0x482   :  { %v896_v44 = vmul.f32 1.442695, %v890_v37 }
 0x483   :  { %v887_v41 = vpop.xlane.xlu0 %886  ;;  %v542_v36 = vpop.permute.xlu1 %541 }
 0x484   :  { %v891_v8 = vsub.f32 %v871_v58, %v887_v41 }
 0x486   :  { %v898_v10 = vmul.f32 1.442695, %v891_v8 }
 0x487   :  { %v3274_v7 = vpop.permute.xlu0 %1413  ;;  %v544_v11 = vpop.permute.xlu1 %543 }
 0x488   :  { %1421 = vrot.lane.b32.xlu1 %v3274_v7, %s3009_s6  ;;  %2871 = vpow2.f32 %v898_v10 }
 0x489   :  { %v3293_v40 = vpop.eup %2869  ;;  %2873 = vpow2.f32 %v892_v62 }
 0x48a   :  { %v903_v55 = vsel %vm691_vm2, %v3293_v40, 0.0  ;;  %2875 = vpow2.f32 %v896_v44 }
 0x48b   :  { %v540_v9 = vpop.permute.xlu0 %539 }
 0x48c   :  { %1423 = vrot.lane.b32.xlu1 %v3266_v4, %s3009_s6  ;;  %v551_v12 = vcombine.low %v540_v9, %v544_v11  ;;  %v552_v13 = vcombine.high %v540_v9, %v544_v11  ;;  %s3014_s6 = smov [#allocation8]  }
 0x48e   :  { %v559_v19 = vrot.slane %v551_v12, %v3176_v56  ;;  %v566_v20 = vrot.slane %v552_v13, %v3176_v56 }
 0x48f   :  { %v546_v16 = vpop.permute.xlu0 %545 }
 0x490   :  { %v567_v17 = vcombine.low %v542_v36, %v546_v16  ;;  %v568_v18 = vcombine.high %v542_v36, %v546_v16  ;;  %1263 = vrot.lane.b32.xlu1 %v3281_v14, %s3007_s4 }
 0x492   :  { %v575_v21 = vrot.slane %v567_v17, %v3176_v56  ;;  %v582_v22 = vrot.slane %v568_v18, %v3176_v56 }
 0x493   :  { %v1420_v13 = vpop.permute.xlu0 %1419 }
 0x494   :  { %v583_v23 = vcombine.low %v559_v19, %v575_v21  ;;  %v584_v24 = vcombine.high %v559_v19, %v575_v21  ;;  %v599_v25 = vcombine.low %v566_v20, %v582_v22  ;;  %v600_v26 = vcombine.high %v566_v20, %v582_v22 }
 0x495   :  { %v3302_v57 = vpop.eup %2871 }
 0x496   :  { %v591_v27 = vrot.slane %v583_v23, %v3179_v63  ;;  %v598_v28 = vrot.slane %v584_v24, %v3179_v63  ;;  %v607_v30 = vrot.slane %v599_v25, %v3179_v63  ;;  %v614_v31 = vrot.slane %v600_v26, %v3179_v63  ;;  %v3320_v42 = vpop.eup %2873 }
 0x497   :  { %v909_v41 = vsel %vm691_vm2, %v3302_v57, 0.0  ;;  %v900_v9 = vsel %vm691_vm2, %v3320_v42, 0.0  ;;  %v3324_v10 = vpop.eup %2875 }
 0x498   :  { %v619_v33 = vcombine.low %v591_v27, %v598_v28  ;;  %v2599_v34 = vcombine.high %v591_v27, %v598_v28  ;;  %v635_v35 = vcombine.low %v607_v30, %v614_v31  ;;  %v2600_v38 = vcombine.high %v607_v30, %v614_v31 }
 0x499   :  { %v906_v11 = vsel %vm691_vm2, %v3324_v10, 0.0 }
 0x49a   :  { %v626_v43 = vrot.slane %v619_v33, %v3176_v56  ;;  %v634_v45 = vrot.slane %v2599_v34, %v3176_v56  ;;  %v642_v46 = vrot.slane %v635_v35, %v3176_v56  ;;  %v650_v47 = vrot.slane %v2600_v38, %v3176_v56 }
 0x49c   :  { %v651_v49 = vcombine.low %v626_v43, %v634_v45  ;;  %v667_v50 = vcombine.low %v642_v46, %v650_v47  ;;  %v652_v52 = vcombine.high %v626_v43, %v634_v45  ;;  %v668_v53 = vcombine.high %v642_v46, %v650_v47 }
 0x49e   :  { %v659_v58 = vrot.slane %v651_v49, %v3179_v63  ;;  %v675_v59 = vrot.slane %v667_v50, %v3179_v63  ;;  %v666_v60 = vrot.slane %v652_v52, %v3179_v63  ;;  %v682_v61 = vrot.slane %v668_v53, %v3179_v63 }
 0x49f   :  { %904 = vadd.xlane.f32.xlu0 %v903_v55 }
 0x4a0   :  { %v683_v0 = vcombine.low %v659_v58, %v675_v59  ;;  %v684_v1 = vcombine.high %v659_v58, %v675_v59  ;;  %v3310_v2 = vcombine.high %v666_v60, %v682_v61  ;;  %v3312_v3 = vcombine.low %v666_v60, %v682_v61 }
 0x4a2   :  { %v687_v6 = vpack.c.bf16 %v683_v0, %v683_v0  ;;  %v688_v36 = vpack.c.bf16 %v684_v1, %v684_v1  ;;  %v690_v61 = vpack.c.bf16 %v3310_v2, %v3310_v2 }
 0x4a3   :  { %910 = vadd.xlane.f32.xlu0 %v909_v41 }
 0x4a4   :  { %v929_v8 = vsel %vm927_vm4, %v687_v6, 0  ;;  %v975_v54 = vsel %vm927_vm4, %v688_v36, 0  ;;  %v1067_v6 = vsel %vm927_vm4, %v690_v61, 0 }
 0x4a5   :  { %2722 = vmatpush3.bf16.msra.mxu1 %v929_v8  ;;  %2728 = vmatpush3.bf16.msra.mxu0 %v975_v54 }
 0x4a6   :  { %2739 = vmatprep.subr.bf16.mxu0 %v3004_v15  ;;  %2733 = vmatprep.subr.bf16.mxu1 %v3004_v15 }
 0x4b4   :  { %901 = vadd.xlane.f32.xlu1 %v900_v9 }
 0x4b8   :  { %907 = vadd.xlane.f32.xlu1 %v906_v11 }
 0x4b9   :  { %1266 = vrot.lane.b32.xlu0 %v3281_v14, %s3006_s3 }
 0x4c9   :  { %1269 = vrot.lane.b32.xlu1 %v3281_v14, %s3008_s18 }
 0x4f2   :  { %v1426_v19 = vpop.permute.xlu0 %1425 }
 0x4fa   :  { %v1422_v12 = vpop.permute.xlu1 %1421 }
 0x4fb   :  { %v1447_v20 = vcombine.low %v1422_v12, %v1426_v19  ;;  %v1448_v21 = vcombine.high %v1422_v12, %v1426_v19 }
 0x4fd   :  { %v1455_v24 = vrot.slane %v1447_v20, %v3176_v56  ;;  %v1462_v25 = vrot.slane %v1448_v21, %v3176_v56 }
 0x4fe   :  { %v1424_v16 = vpop.permute.xlu1 %1423 }
 0x4ff   :  { %v1431_v17 = vcombine.low %v1420_v13, %v1424_v16  ;;  %v1432_v18 = vcombine.high %v1420_v13, %v1424_v16 }
 0x501   :  { %v1439_v22 = vrot.slane %v1431_v17, %v3176_v56  ;;  %v1446_v23 = vrot.slane %v1432_v18, %v3176_v56 }
 0x502   :  { %v1264_v0 = vpop.permute.xlu1 %1263 }
 0x503   :  { %v1463_v26 = vcombine.low %v1439_v22, %v1455_v24  ;;  %v1464_v27 = vcombine.high %v1439_v22, %v1455_v24  ;;  %v1479_v28 = vcombine.low %v1446_v23, %v1462_v25  ;;  %v1480_v30 = vcombine.high %v1446_v23, %v1462_v25 }
 0x505   :  { %v1471_v31 = vrot.slane %v1463_v26, %v3179_v63  ;;  %v1478_v33 = vrot.slane %v1464_v27, %v3179_v63  ;;  %v1487_v34 = vrot.slane %v1479_v28, %v3179_v63  ;;  %v1494_v35 = vrot.slane %v1480_v30, %v3179_v63 }
 0x507   :  { %v1499_v43 = vcombine.low %v1471_v31, %v1478_v33  ;;  %v2613_v45 = vcombine.high %v1471_v31, %v1478_v33  ;;  %v1515_v46 = vcombine.low %v1487_v34, %v1494_v35  ;;  %v2614_v47 = vcombine.high %v1487_v34, %v1494_v35 }
 0x508   :  { %v689_v35 = vpack.c.bf16 %v3312_v3, %v3312_v3 }
 0x509   :  { %v1506_v49 = vrot.slane %v1499_v43, %v3176_v56  ;;  %v1514_v50 = vrot.slane %v2613_v45, %v3176_v56  ;;  %v1522_v52 = vrot.slane %v1515_v46, %v3176_v56  ;;  %v1530_v53 = vrot.slane %v2614_v47, %v3176_v56 }
 0x50a   :  { %v1021_v3 = vsel %vm927_vm4, %v689_v35, 0 }
 0x50b   :  { %v1531_v55 = vcombine.low %v1506_v49, %v1514_v50  ;;  %v1547_v58 = vcombine.low %v1522_v52, %v1530_v53  ;;  %v1532_v22 = vcombine.high %v1506_v49, %v1514_v50  ;;  %v1548_v23 = vcombine.high %v1522_v52, %v1530_v53 }
 0x50d   :  { %v1539_v62 = vrot.slane %v1531_v55, %v3179_v63  ;;  %v1555_v37 = vrot.slane %v1547_v58, %v3179_v63  ;;  %v1562_v43 = vrot.slane %v1548_v23, %v3179_v63 }
 0x50f   :  { %v1564_v36 = vcombine.high %v1539_v62, %v1555_v37  ;;  %v1563_v58 = vcombine.low %v1539_v62, %v1555_v37 }
 0x511   :  { %v1568_v44 = vpack.c.bf16 %v1564_v36, %v1564_v36 }
 0x513   :  { %v1773_v11 = vsel %vm691_vm2, %v1568_v44, 0 }
 0x528   :  { %v905_v38 = vpop.xlane.xlu0 %904 }
 0x529   :  { %2877 = vrcp.f32 %v905_v38  ;;  %v1546_v38 = vrot.slane %v1532_v22, %v3179_v63 }
 0x52b   :  { %v1566_v61 = vcombine.high %v1546_v38, %v1562_v43 }
 0x52c   :  { %v911_v48 = vpop.xlane.xlu0 %910 }
 0x52d   :  { %2879 = vrcp.f32 %v911_v48  ;;  %v1570_v62 = vpack.c.bf16 %v1566_v61, %v1566_v61 }
 0x530   :  { %v1267_v8 = vpop.permute.xlu0 %1266 }
 0x531   :  { %v1272_v12 = vcombine.low %v3281_v14, %v1267_v8  ;;  %v1273_v13 = vcombine.high %v3281_v14, %v1267_v8 }
 0x533   :  { %v1280_v18 = vrot.slane %v1272_v12, %v3176_v56  ;;  %v1287_v19 = vrot.slane %v1273_v13, %v3176_v56 }
 0x536   :  { %v2878_v59 = vpop.eup %2877 }
 0x537   :  { %v917_v60 = vmul.f32 %v2878_v59, %v3293_v40 }
 0x539   :  { %v921_v1 = vpack.c.bf16 %v917_v60, %v917_v60 }
 0x53a   :  { %v2880_v41 = vpop.eup %2879 }
 0x53b   :  { %2730 = vmatmul.mubr.msk.bf16.vlgmr.msra.gmra.mxu0 %vm691_vm2, %v921_v1  ;;  %v919_v2 = vmul.f32 %v2880_v41, %v3302_v57 }
 0x53c   :  { %2740 = vmatpush3.bf16.msra.mxu0 %v1067_v6  ;;  %2741 = vmatprep.mubr.msk.bf16.mxu0 %vm3005_vm1, %v3004_v15 }
 0x53d   :  { %v902_v40 = vpop.xlane.xlu1 %901  ;;  %2751 = vmatprep.subr.bf16.mxu0 %v3004_v15  ;;  %v923_v9 = vpack.c.bf16 %v919_v2, %v919_v2 }
 0x53e   :  { %2881 = vrcp.f32 %v902_v40  ;;  %v1567_v40 = vpack.c.bf16 %v1563_v58, %v1563_v58 }
 0x541   :  { %v908_v54 = vpop.xlane.xlu1 %907 }
 0x542   :  { %2883 = vrcp.f32 %v908_v54 }
 0x543   :  { %2742 = vmatmul.mubr.msk.bf16.vlgmr.msra.gmra.mxu0 %vm691_vm2, %v923_v9  ;;  %v1727_v9 = vsel %vm691_vm2, %v1567_v40, 0 }
 0x544   :  { %2752 = vmatpush3.bf16.xpose.msra.mxu0 %v1773_v11  ;;  %2753 = vmatprep.mubr.msk.bf16.mxu0 %vm3005_vm1, %v3004_v15  ;;  %v1865_v11 = vsel %vm691_vm2, %v1570_v62, 0 }
 0x545   :  { %v1270_v16 = vpop.permute.xlu1 %1269  ;;  %2763 = vmatprep.subr.bf16.mxu0 %v3004_v15 }
 0x546   :  { %v1288_v57 = vcombine.low %v1264_v0, %v1270_v16  ;;  %v1289_v17 = vcombine.high %v1264_v0, %v1270_v16 }
 0x548   :  { %v1296_v20 = vrot.slane %v1288_v57, %v3176_v56  ;;  %v1303_v21 = vrot.slane %v1289_v17, %v3176_v56 }
 0x54a   :  { %v1304_v14 = vcombine.low %v1280_v18, %v1296_v20  ;;  %v1305_v24 = vcombine.high %v1280_v18, %v1296_v20  ;;  %v1320_v25 = vcombine.low %v1287_v19, %v1303_v21  ;;  %v1321_v26 = vcombine.high %v1287_v19, %v1303_v21 }
 0x54b   :  { %v2882_v27 = vpop.eup %2881 }
 0x54c   :  { %v1312_v28 = vrot.slane %v1304_v14, %v3179_v63  ;;  %v1319_v30 = vrot.slane %v1305_v24, %v3179_v63  ;;  %v1328_v31 = vrot.slane %v1320_v25, %v3179_v63  ;;  %v1335_v33 = vrot.slane %v1321_v26, %v3179_v63 }
 0x54d   :  { %v916_v34 = vmul.f32 %v2882_v27, %v3320_v42 }
 0x54e   :  { %v1340_v45 = vcombine.low %v1312_v28, %v1319_v30  ;;  %v2611_v46 = vcombine.high %v1312_v28, %v1319_v30  ;;  %v1356_v47 = vcombine.low %v1328_v31, %v1335_v33  ;;  %v2612_v48 = vcombine.high %v1328_v31, %v1335_v33  ;;  %v95_v31 = vld [vmem:[#allocation2 + $0x1] sm:$0x1] }
 0x54f   :  { %v920_v49 = vpack.c.bf16 %v916_v34, %v916_v34  ;;  %v2884_v50 = vpop.eup %2883  ;;  %vm97_vm5 = vcmp.gt.f32.partialorder %v95_v31, 0.5 }
 0x550   :  { %v1347_v52 = vrot.slane %v1340_v45, %v3176_v56  ;;  %v1355_v53 = vrot.slane %v2611_v46, %v3176_v56  ;;  %v1363_v55 = vrot.slane %v1356_v47, %v3176_v56  ;;  %v1371_v42 = vrot.slane %v2612_v48, %v3176_v56 }
 0x551   :  { %2724 = vmatmul.mubr.msk.bf16.vlgmr.msra.gmra.mxu1 %vm691_vm2, %v920_v49  ;;  %v918_v0 = vmul.f32 %v2884_v50, %v3324_v10  ;;  %v1565_v10 = vcombine.low %v1546_v38, %v1562_v43  ;;  %v99_v33 = vsel %vm97_vm5, -1e+30, %v3004_v15 }
 0x552   :  { %v1372_v59 = vcombine.low %v1347_v52, %v1355_v53  ;;  %v1388_v60 = vcombine.low %v1363_v55, %v1371_v42  ;;  %2734 = vmatpush3.bf16.msra.mxu1 %v1021_v3  ;;  %2735 = vmatprep.mubr.msk.bf16.mxu1 %vm3005_vm1, %v3004_v15  ;;  %v1373_v1 = vcombine.high %v1347_v52, %v1355_v53 }
 0x553   :  { %2745 = vmatprep.subr.bf16.mxu1 %v3004_v15  ;;  %v1389_v41 = vcombine.high %v1363_v55, %v1371_v42  ;;  %v922_v37 = vpack.c.bf16 %v918_v0, %v918_v0  ;;  %v1569_v16 = vpack.c.bf16 %v1565_v10, %v1565_v10  ;;  %v109_v38 = vrot.slane %v99_v33, %v104_v29 }
 0x554   :  { %v1380_v6 = vrot.slane %v1372_v59, %v3179_v63  ;;  %v1396_v36 = vrot.slane %v1388_v60, %v3179_v63  ;;  %v1387_v8 = vrot.slane %v1373_v1, %v3179_v63 }
 0x555   :  { %v1403_v54 = vrot.slane %v1389_v41, %v3179_v63  ;;  %v1819_v18 = vsel %vm691_vm2, %v1569_v16, 0  ;;  %v113_v46 = vadd.f32 %v109_v38, %v3237_v32 }
 0x556   :  { %v1405_v2 = vcombine.high %v1380_v6, %v1396_v36  ;;  %v1404_v12 = vcombine.low %v1380_v6, %v1396_v36 }
 0x557   :  { %v1407_v13 = vcombine.high %v1387_v8, %v1403_v54  ;;  %v1406_v19 = vcombine.low %v1387_v8, %v1403_v54 }
 0x558   :  { %v1409_v44 = vpack.c.bf16 %v1405_v2, %v1405_v2  ;;  %v1408_v57 = vpack.c.bf16 %v1404_v12, %v1404_v12 }
 0x559   :  { %2736 = vmatmul.mubr.msk.bf16.vlgmr.msra.gmra.mxu1 %vm691_vm2, %v922_v37  ;;  %v1411_v17 = vpack.c.bf16 %v1407_v13, %v1407_v13  ;;  %v1410_v20 = vpack.c.bf16 %v1406_v19, %v1406_v19 }
 0x55a   :  { %2746 = vmatpush3.bf16.xpose.msra.mxu1 %v1727_v9  ;;  %2754 = vmatmul.mubr.msk.bf16.vlgmr.msra.gmra.mxu0 %vm691_vm2, %v1409_v44 }
 0x55b   :  { %2764 = vmatpush3.bf16.xpose.msra.mxu0 %v1865_v11  ;;  %2747 = vmatprep.mubr.msk.bf16.mxu1 %vm3005_vm1, %v3004_v15 }
 0x55c   :  { %2757 = vmatprep.subr.bf16.mxu1 %v3004_v15  ;;  %2765 = vmatprep.mubr.msk.bf16.mxu0 %vm3005_vm1, %v3004_v15 }
 0x55d   :  { %2775 = vmatprep.subr.bf16.mxu0 %v3004_v15 }
 0x561   :  { %2748 = vmatmul.mubr.msk.bf16.vlgmr.msra.gmra.mxu1 %vm691_vm2, %v1408_v57 }
 0x562   :  { %2758 = vmatpush3.bf16.xpose.msra.mxu1 %v1819_v18  ;;  %2766 = vmatmul.mubr.msk.bf16.vlgmr.msra.gmra.mxu0 %vm691_vm2, %v1411_v17 }
 0x563   :  { %2759 = vmatprep.mubr.msk.bf16.mxu1 %vm3005_vm1, %v3004_v15  ;;  %2769 = vmatprep.subr.bf16.mxu1 %v3004_v15 }
 0x564   :  { %2777 = vmatprep.mubr.msk.bf16.mxu0 %vm3005_vm1, %v3004_v15 }
 0x569   :  { %2760 = vmatmul.mubr.msk.bf16.vlgmr.msra.gmra.mxu1 %vm691_vm2, %v1410_v20 }
 0x56a   :  { %2771 = vmatprep.mubr.msk.bf16.mxu1 %vm3005_vm1, %v3004_v15 }
 0x5fb   :  { %v1011_v21 = vpop.f32.mrf.mxu0 }
 0x5fd   :  { %v2731_v22 = vpop.f32.mrf.mxu0 }
 0x5ff   :  { %v1014_v23 = vpop.f32.mrf.mxu0 }
 0x601   :  { %v2732_v14 = vpop.f32.mrf.mxu0 }
 0x603   :  { %v1103_v24 = vpop.f32.mrf.mxu0 }
 0x604   :  { %v1125_v25 = vcombine.low %v1011_v21, %v1103_v24  ;;  %v1126_v26 = vcombine.high %v1011_v21, %v1103_v24 }
 0x605   :  { %v2743_v27 = vpop.f32.mrf.mxu0 }
 0x606   :  { %v1133_v55 = vrot.slane %v1125_v25, %v3176_v56  ;;  %v1140_v42 = vrot.slane %v1126_v26, %v3176_v56 }
 0x607   :  { %v1106_v28 = vpop.f32.mrf.mxu0 }
 0x609   :  { %v2744_v30 = vpop.f32.mrf.mxu0 }
 0x611   :  { %v965_v34 = vpop.f32.mrf.mxu1 }
 0x613   :  { %v2725_v35 = vpop.f32.mrf.mxu1 }
 0x615   :  { %v968_v43 = vpop.f32.mrf.mxu1 }
 0x617   :  { %v2726_v45 = vpop.f32.mrf.mxu1 }
 0x619   :  { %v1057_v47 = vpop.f32.mrf.mxu1 }
 0x61a   :  { %v1109_v48 = vcombine.low %v965_v34, %v1057_v47  ;;  %v1110_v49 = vcombine.high %v965_v34, %v1057_v47  ;;  %v1809_v50 = vpop.f32.mrf.mxu0 }
 0x61b   :  { %v2737_v52 = vpop.f32.mrf.mxu1  ;;  %v3414_v53 = vadd.f32 %v1809_v50, %v113_v46 }
 0x61c   :  { %v1117_v3 = vrot.slane %v1109_v48, %v3176_v56  ;;  %v1124_v51 = vrot.slane %v1110_v49, %v3176_v56  ;;  %v2755_v29 = vpop.f32.mrf.mxu0 }
 0x61d   :  { %v1060_v58 = vpop.f32.mrf.mxu1  ;;  %v1910_v32 = vsel %vm691_vm2, %v3414_v53, -inf }
 0x61e   :  { %v1141_v59 = vcombine.low %v1117_v3, %v1133_v55  ;;  %v1142_v60 = vcombine.high %v1117_v3, %v1133_v55  ;;  %v1157_v61 = vcombine.low %v1124_v51, %v1140_v42  ;;  %v1158_v0 = vcombine.high %v1124_v51, %v1140_v42  ;;  %1911 = vmax.xlane.f32.xlu1 %v1910_v32  ;;  %v1812_v1 = vpop.f32.mrf.mxu0 }
 0x61f   :  { %v2738_v41 = vpop.f32.mrf.mxu1 }
 0x620   :  { %v1149_v6 = vrot.slane %v1141_v59, %v3179_v63  ;;  %v1156_v36 = vrot.slane %v1142_v60, %v3179_v63  ;;  %v1165_v40 = vrot.slane %v1157_v61, %v3179_v63  ;;  %v1172_v2 = vrot.slane %v1158_v0, %v3179_v63  ;;  %v2756_v62 = vpop.f32.mrf.mxu0 }
 0x621   :  { %v1763_v37 = vpop.f32.mrf.mxu1 }
 0x622   :  { %v1177_v44 = vcombine.low %v1149_v6, %v1156_v36  ;;  %v2609_v8 = vcombine.high %v1149_v6, %v1156_v36  ;;  %v1193_v54 = vcombine.low %v1165_v40, %v1172_v2  ;;  %v2610_v9 = vcombine.high %v1165_v40, %v1172_v2  ;;  %v1901_v10 = vpop.f32.mrf.mxu0 }
 0x623   :  { %v1764_v11 = vadd.f32 %v1763_v37, %v113_v46  ;;  %v2749_v12 = vpop.f32.mrf.mxu1  ;;  %v1902_v48 = vadd.f32 %v1901_v10, %v113_v46 }
 0x624   :  { %v2767_v13 = vpop.f32.mrf.mxu0  ;;  %v1184_v16 = vrot.slane %v1177_v44, %v3176_v56  ;;  %v1192_v57 = vrot.slane %v2609_v8, %v3176_v56  ;;  %v1200_v17 = vrot.slane %v1193_v54, %v3176_v56  ;;  %v1208_v18 = vrot.slane %v2610_v9, %v3176_v56 }
 0x625   :  { %v1907_v19 = vsel %vm691_vm2, %v1764_v11, -inf  ;;  %v1766_v20 = vpop.f32.mrf.mxu1  ;;  %v1916_v55 = vsel %vm691_vm2, %v1902_v48, -inf }
 0x626   :  { %1908 = vmax.xlane.f32.xlu0 %v1907_v19  ;;  %v1904_v21 = vpop.f32.mrf.mxu0  ;;  %v1210_v22 = vcombine.high %v1184_v16, %v1192_v57  ;;  %v1226_v23 = vcombine.high %v1200_v17, %v1208_v18  ;;  %v1209_v14 = vcombine.low %v1184_v16, %v1192_v57  ;;  %v1225_v24 = vcombine.low %v1200_v17, %v1208_v18 }
 0x627   :  { %v2750_v25 = vpop.f32.mrf.mxu1 }
 0x628   :  { %v2768_v26 = vpop.f32.mrf.mxu0  ;;  %v3432_v27 = vrot.slane %v1210_v22, %v3179_v63  ;;  %v3435_v28 = vrot.slane %v1226_v23, %v3179_v63  ;;  %v3438_v30 = vrot.slane %v1209_v14, %v3179_v63  ;;  %v3441_v31 = vrot.slane %v1225_v24, %v3179_v63 }
 0x629   :  { %v1855_v33 = vpop.f32.mrf.mxu1 }
 0x62a   :  { %v1856_v34 = vadd.f32 %v1855_v33, %v113_v46  ;;  %v1243_v35 = vcombine.low %v3432_v27, %v3435_v28  ;;  %v1241_v38 = vcombine.low %v3438_v30, %v3441_v31  ;;  %v1242_v43 = vcombine.high %v3438_v30, %v3441_v31  ;;  %v2627_v30 = vld [vmem:[%s3627_s8] ss:$0 sm:$0xff] }
 0x62b   :  { %v2761_v45 = vpop.f32.mrf.mxu1  ;;  %v1244_v47 = vcombine.high %v3432_v27, %v3435_v28 }
 0x62c   :  { %v1913_v49 = vsel %vm691_vm2, %v1856_v34, -inf }
 0x62d   :  { %1914 = vmax.xlane.f32.xlu0 %v1913_v49  ;;  %v1858_v50 = vpop.f32.mrf.mxu1 }
 0x62f   :  { %v2762_v52 = vpop.f32.mrf.mxu1  ;;  %1573 = vrot.lane.b32.xlu1 %v3274_v7, %s3002_s2 }
 0x631   :  { %1917 = vmax.xlane.f32.xlu0 %v1916_v55 }
 0x633   :  { %1575 = vrot.lane.b32.xlu1 %v3266_v4, %s3002_s2 }
 0x6a7   :  { %v1912_v42 = vpop.xlane.xlu1 %1911 }
 0x6a8   :  { %v1920_v3 = vsub.f32 %v3414_v53, %v1912_v42 }
 0x6aa   :  { %v1925_v51 = vmul.f32 1.442695, %v1920_v3 }
 0x6ab   :  { %v1574_v2 = vpop.permute.xlu1 %1573 }
 0x6ac   :  { %2885 = vpow2.f32 %v1925_v51 }
 0x6af   :  { %v1909_v46 = vpop.xlane.xlu0 %1908  ;;  %v1576_v62 = vpop.permute.xlu1 %1575 }
 0x6b0   :  { %v1919_v29 = vsub.f32 %v1764_v11, %v1909_v46 }
 0x6b2   :  { %v1923_v58 = vmul.f32 1.442695, %v1919_v29 }
 0x6b4   :  { %2887 = vpow2.f32 %v1923_v58 }
 0x6b6   :  { %v1915_v53 = vpop.xlane.xlu0 %1914 }
 0x6b7   :  { %v1921_v1 = vsub.f32 %v1856_v34, %v1915_v53 }
 0x6b9   :  { %v3458_v32 = vpop.eup %2885  ;;  %v1927_v41 = vmul.f32 1.442695, %v1921_v1 }
 0x6ba   :  { %v1934_v7 = vsel %vm691_vm2, %v3458_v32, 0.0  ;;  %v1918_v60 = vpop.xlane.xlu0 %1917 }
 0x6bb   :  { %1935 = vadd.xlane.f32.xlu1 %v1934_v7  ;;  %v1922_v61 = vsub.f32 %v1902_v48, %v1918_v60 }
 0x6bd   :  { %v1929_v0 = vmul.f32 1.442695, %v1922_v61 }
 0x6bf   :  { %2889 = vpow2.f32 %v1929_v0 }
 0x6c0   :  { %2891 = vpow2.f32 %v1927_v41 }
 0x6c1   :  { %v3462_v59 = vpop.eup %2887 }
 0x6c2   :  { %v1931_v4 = vsel %vm691_vm2, %v3462_v59, 0.0 }
 0x6c3   :  { %1932 = vadd.xlane.f32.xlu0 %v1931_v4 }
 0x6cc   :  { %1577 = vrot.lane.b32.xlu1 %v3270_v5, %s3002_s2  ;;  %v3470_v6 = vpop.eup %2889 }
 0x6cd   :  { %v1940_v36 = vsel %vm691_vm2, %v3470_v6, 0.0  ;;  %v3474_v40 = vpop.eup %2891 }
 0x6ce   :  { %v1937_v5 = vsel %vm691_vm2, %v3474_v40, 0.0 }
 0x6d9   :  { %1571 = vrot.lane.b32.xlu0 %v3151_v39, %s3002_s2  ;;  %s2576_s2 = sshll.u32 %s3014_s6, 4  ;;  %s2577_s2 = int_to_ptr.vmem [resolvable:$true] %s2576_s2 }
 0x6da   :  { %s2971_s19 = scalar_lea.vmem %s2577_s2, 256  ;;  %p2976_p2 = scmp.lt.s32.totalorder %s2577_s2, %s2577_s2 }
 0x6db   :  { %p2972_p1 = scmp.ne.s32.totalorder %s2577_s2, %s2971_s19  ;;  %p2977_p3 = scmp.lt.s32.totalorder %s2971_s19, %s2971_s19 }
 0x6dd   :  { %p2978_p4 = por %p2977_p3, %p2976_p2 }
 0x6df   :  { %p2979_p5 = pnand %p2978_p4, %p2972_p1 }
 0x6f0   :  { %1941 = vadd.xlane.f32.xlu1 %v1940_v36 }
 0x6f8   :  { %1938 = vadd.xlane.f32.xlu0 %v1937_v5 }
 0x744   :  { %v1936_v39 = vpop.xlane.xlu1 %1935 }
 0x745   :  { %2893 = vrcp.f32 %v1936_v39 }
 0x748   :  { %v1578_v37 = vpop.permute.xlu1 %1577 }
 0x749   :  { %v1599_v8 = vcombine.low %v1574_v2, %v1578_v37  ;;  %v1600_v54 = vcombine.high %v1574_v2, %v1578_v37 }
 0x74b   :  { %v1607_v12 = vrot.slane %v1599_v8, %v3176_v56  ;;  %v1614_v13 = vrot.slane %v1600_v54, %v3176_v56 }
 0x74c   :  { %v1933_v44 = vpop.xlane.xlu0 %1932 }
 0x74d   :  { %2895 = vrcp.f32 %v1933_v44 }
 0x750   :  { %v1572_v9 = vpop.permute.xlu0 %1571 }
 0x751   :  { %v1583_v10 = vcombine.low %v1572_v9, %v1576_v62  ;;  %v1584_v11 = vcombine.high %v1572_v9, %v1576_v62 }
 0x752   :  { %v2894_v3 = vpop.eup %2893 }
 0x753   :  { %v1591_v16 = vrot.slane %v1583_v10, %v3176_v56  ;;  %v1598_v57 = vrot.slane %v1584_v11, %v3176_v56  ;;  %v1948_v36 = vmul.f32 %v2894_v3, %v3458_v32 }
 0x755   :  { %v1615_v17 = vcombine.low %v1591_v16, %v1607_v12  ;;  %v1616_v18 = vcombine.high %v1591_v16, %v1607_v12  ;;  %v1631_v19 = vcombine.low %v1598_v57, %v1614_v13  ;;  %v1632_v20 = vcombine.high %v1598_v57, %v1614_v13 }
 0x756   :  { %v1952_v44 = vpack.c.bf16 %v1948_v36, %v1948_v36  ;;  %v2857_v36 = vld [vmem:[%s3626_s7 + $0x8] sm:$0xff]  }
 0x757   :  { %v1623_v21 = vrot.slane %v1615_v17, %v3179_v63  ;;  %v1630_v22 = vrot.slane %v1616_v18, %v3179_v63  ;;  %v1639_v23 = vrot.slane %v1631_v19, %v3179_v63  ;;  %v1646_v14 = vrot.slane %v1632_v20, %v3179_v63 }
 0x759   :  { %v1651_v24 = vcombine.low %v1623_v21, %v1630_v22  ;;  %v2615_v25 = vcombine.high %v1623_v21, %v1630_v22  ;;  %v1667_v26 = vcombine.low %v1639_v23, %v1646_v14  ;;  %v2616_v33 = vcombine.high %v1639_v23, %v1646_v14 }
 0x75a   :  { %v2896_v7 = vpop.eup %2895 }
 0x75b   :  { %v1658_v34 = vrot.slane %v1651_v24, %v3176_v56  ;;  %v1666_v45 = vrot.slane %v2615_v25, %v3176_v56  ;;  %v1674_v48 = vrot.slane %v1667_v26, %v3176_v56  ;;  %v1682_v49 = vrot.slane %v2616_v33, %v3176_v56 }
 0x75c   :  { %v1947_v41 = vmul.f32 %v2896_v7, %v3462_v59 }
 0x75d   :  { %v1683_v50 = vcombine.low %v1658_v34, %v1666_v45  ;;  %v1699_v52 = vcombine.low %v1674_v48, %v1682_v49  ;;  %v1684_v55 = vcombine.high %v1658_v34, %v1666_v45  ;;  %v1700_v42 = vcombine.high %v1674_v48, %v1682_v49 }
 0x75e   :  { %v1951_v37 = vpack.c.bf16 %v1947_v41, %v1947_v41 }
 0x75f   :  { %v1691_v51 = vrot.slane %v1683_v50, %v3179_v63  ;;  %v1707_v46 = vrot.slane %v1699_v52, %v3179_v63  ;;  %v1698_v29 = vrot.slane %v1684_v55, %v3179_v63  ;;  %v1714_v58 = vrot.slane %v1700_v42, %v3179_v63 }
 0x761   :  { %v1715_v4 = vcombine.low %v1691_v51, %v1707_v46  ;;  %v1716_v53 = vcombine.high %v1691_v51, %v1707_v46  ;;  %v1717_v60 = vcombine.low %v1698_v29, %v1714_v58  ;;  %v1718_v61 = vcombine.high %v1698_v29, %v1714_v58 }
 0x763   :  { %v1719_v0 = vpack.c.bf16 %v1715_v4, %v1715_v4  ;;  %v1720_v1 = vpack.c.bf16 %v1716_v53, %v1716_v53  ;;  %v1721_v62 = vpack.c.bf16 %v1717_v60, %v1717_v60  ;;  %v1722_v39 = vpack.c.bf16 %v1718_v61, %v1718_v61 }
 0x765   :  { %v1959_v5 = vsel %vm927_vm4, %v1719_v0, 0  ;;  %v2005_v2 = vsel %vm927_vm4, %v1720_v1, 0  ;;  %v2051_v32 = vsel %vm927_vm4, %v1721_v62, 0  ;;  %v2097_v59 = vsel %vm927_vm4, %v1722_v39, 0 }
 0x766   :  { %2770 = vmatpush3.bf16.msra.mxu1 %v1959_v5  ;;  %2776 = vmatpush3.bf16.msra.mxu0 %v2005_v2 }
 0x767   :  { %2781 = vmatprep.subr.bf16.mxu1 %v3004_v15  ;;  %2787 = vmatprep.subr.bf16.mxu0 %v3004_v15 }
 0x769   :  { %2772 = vmatmul.mubr.msk.bf16.vlgmr.msra.gmra.mxu1 %vm691_vm2, %v1951_v37  ;;  %2778 = vmatmul.mubr.msk.bf16.vlgmr.msra.gmra.mxu0 %vm691_vm2, %v1952_v44 }
 0x76a   :  { %2782 = vmatpush3.bf16.msra.mxu1 %v2051_v32  ;;  %2788 = vmatpush3.bf16.msra.mxu0 %v2097_v59 }
 0x76b   :  { %2789 = vmatprep.mubr.msk.bf16.mxu0 %vm3005_vm1, %v3004_v15  ;;  %2783 = vmatprep.mubr.msk.bf16.mxu1 %vm3005_vm1, %v3004_v15 }
 0x76c   :  { %2793 = vmatprep.subr.bf16.mxu1 %v3004_v15  ;;  %2801 = vmatprep.subr.bf16.mxu0 %v3004_v15 }
 0x779   :  { %v1942_v8 = vpop.xlane.xlu1 %1941 }
 0x77a   :  { %2897 = vrcp.f32 %v1942_v8  ;;  %v2858_v8 = vld [vmem:[%s3626_s7] sm:$0xff]   ;;  %s3012_s7 = smov 8  }
 0x781   :  { %v1939_v54 = vpop.xlane.xlu0 %1938 }
 0x782   :  { %2899 = vrcp.f32 %v1939_v54 }
 0x787   :  { %v2898_v9 = vpop.eup %2897 }
 0x788   :  { %v1950_v10 = vmul.f32 %v2898_v9, %v3470_v6 }
 0x78a   :  { %v1954_v11 = vpack.c.bf16 %v1950_v10, %v1950_v10 }
 0x78c   :  { %2790 = vmatmul.mubr.msk.bf16.vlgmr.msra.gmra.mxu0 %vm691_vm2, %v1954_v11 }
 0x78d   :  { %2805 = vmatprep.mubr.msk.bf16.mxu0 %vm3005_vm1, %v3004_v15 }
 0x78f   :  { %v2900_v12 = vpop.eup %2899 }
 0x790   :  { %v1949_v13 = vmul.f32 %v2900_v12, %v3474_v40 }
 0x792   :  { %v1953_v16 = vpack.c.bf16 %v1949_v13, %v1949_v13 }
 0x794   :  { %2784 = vmatmul.mubr.msk.bf16.vlgmr.msra.gmra.mxu1 %vm691_vm2, %v1953_v16 }
 0x795   :  { %2797 = vmatprep.mubr.msk.bf16.mxu1 %vm3005_vm1, %v3004_v15  ;;  %2794 = vmatpush3.bf16.msra.mxu1 %v2857_v36 }
 0x796   :  { %2795 = vmatprep.subr.bf16.mxu1 %v3004_v15 }
 0x799   :  { %2796 = vmatpush3.bf16.msra.mxu1 %v2858_v8 }
 0x79a   :  { %2809 = vmatprep.subr.bf16.mxu1 %v3004_v15 }
 0x829   :  { %v1995_v57 = vpop.f32.mrf.mxu1  ;;  %v2041_v17 = vpop.f32.mrf.mxu0 }
 0x82b   :  { %v2773_v18 = vpop.f32.mrf.mxu1  ;;  %v2779_v19 = vpop.f32.mrf.mxu0 }
 0x82d   :  { %v1998_v6 = vpop.f32.mrf.mxu1  ;;  %v2044_v20 = vpop.f32.mrf.mxu0 }
 0x82f   :  { %v2774_v21 = vpop.f32.mrf.mxu1  ;;  %v2780_v22 = vpop.f32.mrf.mxu0 }
 0x84c   :  { %v2133_v23 = vpop.f32.mrf.mxu0 }
 0x84d   :  { %v2155_v26 = vcombine.low %v2041_v17, %v2133_v23  ;;  %v2156_v40 = vcombine.high %v2041_v17, %v2133_v23 }
 0x84e   :  { %v2791_v14 = vpop.f32.mrf.mxu0 }
 0x84f   :  { %v2163_v49 = vrot.slane %v2155_v26, %v3176_v56  ;;  %v2170_v50 = vrot.slane %v2156_v40, %v3176_v56 }
 0x850   :  { %v2136_v24 = vpop.f32.mrf.mxu0 }
 0x852   :  { %v2792_v25 = vpop.f32.mrf.mxu0 }
 0x854   :  { %v2087_v33 = vpop.f32.mrf.mxu1 }
 0x855   :  { %v2139_v34 = vcombine.low %v1995_v57, %v2087_v33  ;;  %v2140_v45 = vcombine.high %v1995_v57, %v2087_v33  ;;  %v2909_v33 = vld [vmem:[%s3619_s0] sm:$0xff] }
 0x856   :  { %v2785_v48 = vpop.f32.mrf.mxu1 }
 0x857   :  { %v2147_v52 = vrot.slane %v2139_v34, %v3176_v56  ;;  %v2154_v55 = vrot.slane %v2140_v45, %v3176_v56 }
 0x858   :  { %v2090_v42 = vpop.f32.mrf.mxu1 }
 0x859   :  { %v2171_v3 = vcombine.low %v2147_v52, %v2163_v49  ;;  %v2172_v51 = vcombine.high %v2147_v52, %v2163_v49  ;;  %v2187_v46 = vcombine.low %v2154_v55, %v2170_v50  ;;  %v2188_v29 = vcombine.high %v2154_v55, %v2170_v50  ;;  %v2910_v52 = vld [vmem:[%s3619_s0 + $0x8] sm:$0xff] }
 0x85a   :  { %v2786_v58 = vpop.f32.mrf.mxu1 }
 0x85b   :  { %v2179_v7 = vrot.slane %v2171_v3, %v3179_v63  ;;  %v2186_v4 = vrot.slane %v2172_v51, %v3179_v63  ;;  %v2195_v53 = vrot.slane %v2187_v46, %v3179_v63  ;;  %v2202_v60 = vrot.slane %v2188_v29, %v3179_v63 }
 0x85d   :  { %v2207_v61 = vcombine.low %v2179_v7, %v2186_v4  ;;  %v2625_v0 = vcombine.high %v2179_v7, %v2186_v4  ;;  %v2223_v1 = vcombine.low %v2195_v53, %v2202_v60  ;;  %v2626_v41 = vcombine.high %v2195_v53, %v2202_v60 }
 0x85f   :  { %v2214_v5 = vrot.slane %v2207_v61, %v3176_v56  ;;  %v2222_v2 = vrot.slane %v2625_v0, %v3176_v56  ;;  %v2230_v62 = vrot.slane %v2223_v1, %v3176_v56  ;;  %v2238_v39 = vrot.slane %v2626_v41, %v3176_v56  ;;  %v2859_v0 = vld [vmem:[#allocation7 + $0x8] sm:$0xff]   ;;  %v2860_v1 = vld [vmem:[#allocation7] sm:$0xff]  }
 0x860   :  { %2802 = vmatpush3.bf16.msra.mxu0 %v2859_v0 }
 0x861   :  { %v2240_v37 = vcombine.high %v2214_v5, %v2222_v2  ;;  %v2256_v44 = vcombine.high %v2230_v62, %v2238_v39  ;;  %v2239_v32 = vcombine.low %v2214_v5, %v2222_v2  ;;  %v2255_v59 = vcombine.low %v2230_v62, %v2238_v39  ;;  %2803 = vmatprep.subr.bf16.mxu0 %v3004_v15 }
 0x863   :  { %v2254_v54 = vrot.slane %v2240_v37, %v3179_v63  ;;  %v2270_v9 = vrot.slane %v2256_v44, %v3179_v63  ;;  %v2247_v10 = vrot.slane %v2239_v32, %v3179_v63  ;;  %v2263_v11 = vrot.slane %v2255_v59, %v3179_v63  ;;  %v2631_v32 = vld [vmem:[%s3628_s9] ss:$0 sm:$0xff] }
 0x864   :  { %2804 = vmatpush3.bf16.msra.mxu0 %v2860_v1 }
 0x865   :  { %v2273_v56 = vcombine.low %v2254_v54, %v2270_v9  ;;  %v2272_v12 = vcombine.high %v2247_v10, %v2263_v11  ;;  %v2271_v13 = vcombine.low %v2247_v10, %v2263_v11  ;;  %v2274_v17 = vcombine.high %v2254_v54, %v2270_v9  ;;  %v2632_v9 = vld [vmem:[%s3629_s10] ss:$0 sm:$0xff] }
 0x867   :  { %v2845_v16 = vpack.i.bf16 %v2273_v56, %v1243_v35  ;;  %v2840_v57 = vpack.i.bf16 %v2272_v12, %v1242_v43  ;;  %v2850_v63 = vpack.i.bf16 %v2274_v17, %v1244_v47  ;;  %v2864_v17 = vld [vmem:[%s3632_s13] sm:$0xff]  }
 0x869   :  { %2846 = vrot.lane.b32.xlu1 %v2845_v16, %s2999_s26  ;;  %2841 = vrot.lane.b32.xlu0 %v2840_v57, %s3012_s7  ;;  %v2862_v16 = vld [vmem:[%s3632_s13 + $0x10] sm:$0xff]   ;;  %v2863_v57 = vld [vmem:[%s3632_s13 + $0x8] sm:$0xff]  }
 0x86d   :  { %2851 = vrot.lane.b32.xlu0 %v2850_v63, %s3013_s21  ;;  %v2633_v63 = vld [vmem:[%s3631_s12] ss:$0 sm:$0xff] }
 0x8db   :  { %v2847_v18 = vpop.permute.xlu1 %2846  ;;  %v2842_v19 = vpop.permute.xlu0 %2841 }
 0x8dc   :  { %v2844_v6 = vunpack.i.h.bf16 %v2842_v19  ;;  %v2843_v35 = vunpack.i.l.bf16 %v2842_v19  ;;  %v2849_v20 = vunpack.i.h.bf16 %v2847_v18  ;;  %v2848_v21 = vunpack.i.l.bf16 %v2847_v18 }
 0x8de   :  { %v1257_v43 = vsel %vm691_vm2, %v1241_v38, %v2843_v35  ;;  %v2287_v22 = vsel %vm691_vm2, %v2271_v13, %v2844_v6  ;;  %v2861_v13 = vld [vmem:[%s3632_s13 + $0x18] sm:$0xff]  }
 0x8df   :  { %v2852_v23 = vpop.permute.xlu0 %2851  ;;  %v1259_v47 = vsel %vm1258_vm6, %v1257_v43, %v2848_v21  ;;  %v2288_v14 = vsel %vm1258_vm6, %v2287_v22, %v2849_v20 }
 0x8e0   :  { %v2854_v27 = vunpack.i.h.bf16 %v2852_v23  ;;  %v2853_v28 = vunpack.i.l.bf16 %v2852_v23 }
 0x8e2   :  { %v1261_v24 = vsel %vm1260_vm7, %v1259_v47, %v2853_v28  ;;  %v2289_v25 = vsel %vm1260_vm7, %v2288_v14, %v2854_v27 }
 0x8e3   :  { %v2290_v26 = vpack.c.bf16 %v2289_v25, %v1261_v24 }
 0x8e5   :  { %2798 = vmatmul.mubr.msk.bf16.vlgmr.msra.gmra.mxu1 %vm116_vm0, %v2290_v26 }
 0x8e6   :  { %2817 = vmatprep.mubr.msk.bf16.mxu1 %vm3005_vm1, %v3004_v15  ;;  %2810 = vmatpush3.bf16.msra.mxu1 %v2861_v13 }
 0x8e7   :  { %2811 = vmatprep.subr.bf16.mxu1 %v3004_v15 }
 0x8ea   :  { %2812 = vmatpush3.bf16.msra.mxu1 %v2862_v16 }
 0x8eb   :  { %2813 = vmatprep.subr.bf16.mxu1 %v3004_v15 }
 0x8ee   :  { %2814 = vmatpush3.bf16.msra.mxu1 %v2863_v57 }
 0x8ef   :  { %2815 = vmatprep.subr.bf16.mxu1 %v3004_v15 }
 0x8f2   :  { %2816 = vmatpush3.bf16.msra.mxu1 %v2864_v17 }
 0x9a5   :  { %v2351_v31 = vpop.f32.mrf.mxu1 }
 0x9a6   :  { %v2352_v38 = vadd.f32 %v2627_v30, %v2351_v31 }
 0x9a7   :  { %v2799_v40 = vpop.f32.mrf.mxu1 }
 0x9a8   :  { %v3567_v34 = vadd.f32 %v2909_v33, %v2352_v38 }
 0x9a9   :  { %v2354_v45 = vpop.f32.mrf.mxu1 }
 0x9aa   :  { %v2355_v48 = vadd.f32 %v2627_v30, %v2354_v45  ;;  %v2362_v49 = vsel %vm116_vm0, %v3567_v34, 0.0  ;;  %v2637_v30 = vld [vmem:[%s3633_s14] ss:$0 sm:$0xff] }
 0x9ab   :  { %2363 = vadd.xlane.f32.xlu1 %v2362_v49  ;;  %v2800_v50 = vpop.f32.mrf.mxu1 }
 0x9ac   :  { %v3574_v55 = vadd.f32 %v2910_v52, %v2355_v48 }
 0x9ae   :  { %v2365_v42 = vsel %vm116_vm0, %v3574_v55, 0.0 }
 0x9af   :  { %2366 = vadd.xlane.f32.xlu0 %v2365_v42 }
 0xa34   :  { %v2364_v3 = vpop.xlane.xlu1 %2363 }
 0xa35   :  { %v2368_v51 = vmul.f32 0.03125, %v2364_v3 }
 0xa37   :  { %v2370_v46 = vsub.f32 %v3567_v34, %v2368_v51 }
 0xa38   :  { %v2367_v29 = vpop.xlane.xlu0 %2366 }
 0xa39   :  { %v2369_v58 = vmul.f32 0.03125, %v2367_v29  ;;  %v2372_v7 = vmul.f32 %v2370_v46, %v2370_v46 }
 0xa3b   :  { %v2371_v4 = vsub.f32 %v3574_v55, %v2369_v58  ;;  %v2374_v53 = vsel %vm116_vm0, %v2372_v7, 0.0 }
 0xa3c   :  { %2375 = vadd.xlane.f32.xlu0 %v2374_v53 }
 0xa3d   :  { %v2373_v60 = vmul.f32 %v2371_v4, %v2371_v4 }
 0xa3f   :  { %v2377_v61 = vsel %vm116_vm0, %v2373_v60, 0.0 }
 0xa40   :  { %2378 = vadd.xlane.f32.xlu0 %v2377_v61 }
 0xac5   :  { %v2376_v41 = vpop.xlane.xlu0 %2375 }
 0xac6   :  { %v2380_v36 = vmul.f32 0.03125, %v2376_v41 }
 0xac8   :  { %v2382_v5 = vadd.f32 1e-05, %v2380_v36 }
 0xac9   :  { %v2379_v2 = vpop.xlane.xlu0 %2378 }
 0xaca   :  { %2901 = vrsqrt.f32 %v2382_v5  ;;  %v2381_v62 = vmul.f32 0.03125, %v2379_v2 }
 0xacc   :  { %v2383_v39 = vadd.f32 1e-05, %v2381_v62 }
 0xace   :  { %2903 = vrsqrt.f32 %v2383_v39 }
 0xad7   :  { %v2902_v37 = vpop.eup %2901 }
 0xad8   :  { %v2386_v44 = vmul.f32 %v2902_v37, %v2370_v46 }
 0xada   :  { %v2394_v54 = vmul.f32 %v2631_v32, %v2386_v44 }
 0xadb   :  { %v2904_v59 = vpop.eup %2903 }
 0xadc   :  { %v2387_v8 = vmul.f32 %v2904_v59, %v2371_v4  ;;  %v2402_v11 = vadd.f32 %v2632_v9, %v2394_v54 }
 0xade   :  { %v2395_v10 = vmul.f32 %v2631_v32, %v2387_v8 }
 0xae0   :  { %v2403_v56 = vadd.f32 %v2632_v9, %v2395_v10 }
 0xae2   :  { %v2404_v12 = vpack.c.bf16 %v2403_v56, %v2402_v11 }
 0xae4   :  { %2806 = vmatmul.mubr.msk.bf16.vlgmr.msra.gmra.mxu0 %vm116_vm0, %v2404_v12 }
 0xba4   :  { %v2465_v18 = vpop.f32.mrf.mxu0 }
 0xba5   :  { %v2466_v19 = vadd.f32 %v2633_v63, %v2465_v18 }
 0xba6   :  { %v2807_v6 = vpop.f32.mrf.mxu0 }
 0xba7   :  { %v2474_v35 = vmul.f32 0.70710677, %v2466_v19  ;;  %v2472_v28 = vmul.f32 0.5, %v2466_v19 }
 0xba8   :  { %v2468_v20 = vpop.f32.mrf.mxu0 }
 0xba9   :  { %2905 = verf.f32 %v2474_v35  ;;  %v2469_v21 = vadd.f32 %v2633_v63, %v2468_v20 }
 0xbaa   :  { %v2808_v43 = vpop.f32.mrf.mxu0 }
 0xbab   :  { %v2475_v22 = vmul.f32 0.70710677, %v2469_v21  ;;  %v2473_v47 = vmul.f32 0.5, %v2469_v21 }
 0xbad   :  { %2907 = verf.f32 %v2475_v22 }
 0xbb6   :  { %v2906_v15 = vpop.eup %2905 }
 0xbb7   :  { %v2478_v23 = vadd.f32 1.0, %v2906_v15 }
 0xbb9   :  { %v2480_v24 = vmul.f32 %v2478_v23, %v2472_v28 }
 0xbba   :  { %v2908_v27 = vpop.eup %2907 }
 0xbbb   :  { %v2479_v14 = vadd.f32 1.0, %v2908_v27 }
 0xbbd   :  { %v2481_v25 = vmul.f32 %v2479_v14, %v2473_v47 }
 0xbbf   :  { %v2482_v26 = vpack.c.bf16 %v2481_v25, %v2480_v24 }
 0xbc1   :  { %2818 = vmatmul.mubr.msk.bf16.vlgmr.msra.gmra.mxu1 %vm2522_vm8, %v2482_v26 }
 0xc81   :  { %v2560_v31 = vpop.f32.mrf.mxu1 }
 0xc82   :  { %v2561_v38 = vadd.f32 %v2637_v30, %v2560_v31 }
 0xc83   :  { %v2819_v40 = vpop.f32.mrf.mxu1 }
 0xc84   :  { %v2567_v33 = vadd.f32 %v2561_v38, %v3567_v34 }
 0xc85   :  { %v2563_v45 = vpop.f32.mrf.mxu1 }
 0xc86   :  { %2569 = vst.msk [vmem:[#allocation8] sm:$0xff] %vm116_vm0, %v2567_v33  ;;  %v2564_v48 = vadd.f32 %v2637_v30, %v2563_v45 }
 0xc87   :  { %v2820_v49 = vpop.f32.mrf.mxu1 }
 0xc88   :  { %v2568_v50 = vadd.f32 %v2564_v48, %v3574_v55 }
 0xc8a   :  { %2570 = vst.msk [vmem:[#allocation8 + $0x8] sm:$0xff] %vm116_vm0, %v2568_v50 }
 0xc8b   :  { %2982 = shalt.err (!%p2979_p5)
}
 0xc8c   :  { %s3015_s14 = smov 128  }
 0xc8d   :  { %2582 = dma.vmem_to_hbm [thread:$0]  %s2577_s2, 256, %s3634_s15, [#allocation4], %s3015_s14, %s3015_s14, %s3012_s7  }
 0xc8e   :  { %2995 = dma.done.wait [#allocation4], 256  }
 0xc8f   :  { %2996 = vsyncadd [#allocation4], 4294967040 }
 0xc90   :  { %2586 = vsyncpa [#allocation3], 1 }
 0xc91   :  { %2587 = vsyncpa [#allocation6], 1 }
 0xc92   :  { %2588 = vsyncpa [#allocation4], 1 }

</bundles_post_ra>
